<compile_context>
chip_gen: v6e
topology: v6e:2x2x1
jax: 0.10.0
libtpu: 0.0.40
codegen_flags: <defaults>
</compile_context>

<pallas_src>
import functools

import jax
import jax.numpy as jnp
from jax.experimental import pallas as pl
from jax.experimental.pallas import tpu as pltpu

# ----------------------- synthetic config ("conf" / "dataset") ----------------
N_IMAGES = 8      # dataset.n_images
IMG_W = 64        # dataset.W
IMG_H = 48        # dataset.H
D_IN = 3          # [cidx, x, y]
D_HIDDEN = 32     # model.background_network hidden width (assumed)
D_OUT = 4         # rgb + alpha  (use_init_bkgd=True path)


def _round_up(a, b):
    return ((a + b - 1) // b) * b


# ------------------------------- Pallas kernel --------------------------------
def _bg_mlp_kernel(cam_ref,     # scalar prefetch: camera_id,          SMEM (1,) int32
                   init_ref,    # scalar prefetch: init_background_rgb SMEM (3,) f32
                   xy_ref,      # [2, tile]  row 0 = pixels_x, row 1 = pixels_y (f32)
                   wc_ref,      # [H, 1]     layer-0 weight column for the camera index
                   wx_ref,      # [H, 1]     layer-0 weight column for x
                   wy_ref,      # [H, 1]     layer-0 weight column for y
                   b0_ref,      # [H, 1]
                   w1_ref,      # [H, H]     (= torch w1.T), bf16
                   b1_ref,      # [H, 1]     f32
                   w2_ref,      # [4, H]     (= torch w2.T), bf16
                   b2_ref,      # [4, 1]     f32
                   out_ref,     # [3, tile]
                   *, n_images, img_w, img_h):
    # ---- coordinate normalization (lane-dense [1, tile] rows, VPU, f32) ----
    cam = cam_ref[0].astype(jnp.float32)
    cidx = cam / float(max(n_images - 1, 1)) * 2.0 - 1.0      # scalar
    x = xy_ref[0:1, :] / (img_w - 1) * 2.0 - 1.0              # [1, tile]
    y = xy_ref[1:2, :] / (img_h - 1) * 2.0 - 1.0              # [1, tile]

    # ---- layer 0: camera index folded into the bias; broadcast FMAs on the VPU ----
    b0_eff = b0_ref[...] + cidx * wc_ref[...]                 # [H, 1]
    h = wx_ref[...] * x + wy_ref[...] * y + b0_eff            # [H, tile]
    h = jnp.maximum(h, 0.0)

    # ---- layer 1: [H, H] @ [H, tile]  (MXU, bf16 operands, f32 accumulate) ----
    h = jnp.dot(w1_ref[...], h.astype(jnp.bfloat16),
                preferred_element_type=jnp.float32) + b1_ref[...]
    h = jnp.maximum(h, 0.0)

    # ---- layer 2: [4, H] @ [H, tile] + sigmoid (EUP) ----
    o = jnp.dot(w2_ref[...], h.astype(jnp.bfloat16),
                preferred_element_type=jnp.float32) + b2_ref[...]
    o = jax.nn.sigmoid(o)                                     # [4, tile], f32

    # ---- use_init_bkgd blend:  init + a*(rgb - init)  ==  (1-a)*init + a*rgb ----
    rgb = o[0:3, :]                                           # [3, tile]
    a = o[3:4, :]                                             # [1, tile]
    row = jax.lax.broadcasted_iota(jnp.int32, (3, 1), 0)      # [3, 1] row index
    init_col = jnp.where(row == 0, init_ref[0],
                         jnp.where(row == 1, init_ref[1], init_ref[2]))   # [3, 1]
    out_ref[...] = init_col + a * (rgb - init_col)            # [3, tile] lane-dense store


# --------------------------------- wrapper -------------------------------------
def neus_background_mlp(camera_id, pixels_xy, init_background_rgb, params,
                        *, tile_n=8192):
    """bkgd_mode == 'mlp' forward pass.

    pixels_xy: feature-major [2, N] (row 0 = pixels_x, row 1 = pixels_y).
    Returns the feature-major result [3, n_pad]; columns >= N (if any) are padding
    and should be ignored / sliced by the consumer.
    """
    n = pixels_xy.shape[1]
    d_hidden = params[2].shape[0]

    # Tile selection: biggest tile that fits, but keep >= 2 grid steps whenever there is
    # enough work so both v7x TensorCores get fed under ('parallel',).
    n_lanes = _round_up(max(n, 1), 128)
    tile = max(128, min(tile_n, n_lanes))
    half = _round_up((n_lanes + 1) // 2, 128)
    if n_lanes >= 2048 and tile > half:
        tile = half
    n_pad = _round_up(n_lanes, tile)

    xy = pixels_xy.astype(jnp.float32)
    if n_pad != n:
        # Only taken for ragged N; prefer handing in already lane-padded coordinates.
        xy = jnp.pad(xy, ((0, 0), (0, n_pad - n)))

    cam = jnp.asarray(camera_id, jnp.int32).reshape((1,))
    init = jnp.asarray(init_background_rgb, jnp.float32).reshape((3,))

    # Per-layer weights transposed to feature-major; MXU operands bf16, everything else f32.
    w0, b0, w1, b1, w2, b2 = params
    w0t = w0.T.astype(jnp.float32)                  # [H, 3]
    wc, wx, wy = w0t[:, 0:1], w0t[:, 1:2], w0t[:, 2:3]
    b0c = b0.T.astype(jnp.float32)                  # [H, 1]
    w1p = w1.T.astype(jnp.bfloat16)                 # [H, H]
    b1c = b1.T.astype(jnp.float32)                  # [H, 1]
    w2p = w2.T.astype(jnp.bfloat16)                 # [D_OUT, H]
    b2c = b2.T.astype(jnp.float32)                  # [D_OUT, 1]

    kernel = functools.partial(_bg_mlp_kernel,
                               n_images=N_IMAGES, img_w=IMG_W, img_h=IMG_H)

    const = lambda i, cam, init: (0, 0)
    grid_spec = pltpu.PrefetchScalarGridSpec(
        num_scalar_prefetch=2,                      # camera_id + init rgb live in SMEM
        grid=(n_pad // tile,),
        in_specs=[
            pl.BlockSpec((2, tile), lambda i, cam, init: (0, i)),   # coords [2, N]
            pl.BlockSpec((d_hidden, 1), const),                     # wc
            pl.BlockSpec((d_hidden, 1), const),                     # wx
            pl.BlockSpec((d_hidden, 1), const),                     # wy
            pl.BlockSpec((d_hidden, 1), const),                     # b0
            pl.BlockSpec((d_hidden, d_hidden), const),              # w1^T (bf16)
            pl.BlockSpec((d_hidden, 1), const),                     # b1
            pl.BlockSpec((D_OUT, d_hidden), const),                 # w2^T (bf16)
            pl.BlockSpec((D_OUT, 1), const),                        # b2
        ],
        out_specs=pl.BlockSpec((3, tile), lambda i, cam, init: (0, i)),   # [3, N] lane-dense
    )

    flops = 2 * n_pad * (2 * d_hidden + d_hidden * d_hidden + d_hidden * D_OUT)
    cost = pl.CostEstimate(flops=flops,
                           transcendentals=D_OUT * n_pad,          # sigmoid
                           bytes_accessed=20 * n_pad)               # 8 B in + 12 B out per ray

    return pl.pallas_call(
        kernel,
        out_shape=jax.ShapeDtypeStruct((3, n_pad), jnp.float32),
        grid_spec=grid_spec,
        compiler_params=pltpu.CompilerParams(
            dimension_semantics=("parallel",)),
        cost_estimate=cost,
    )(cam, init, xy, wc, wx, wy, b0c, w1p, b1c, w2p, b2c)


# ------------------------------ pure-JAX reference ------------------------------
def neus_background_mlp_ref(camera_id, pixels_x, pixels_y, init_background_rgb, params):
    w0, b0, w1, b1, w2, b2 = params
    hp = jax.lax.Precision.HIGHEST
    cidx = (camera_id.astype(jnp.float32) / (N_IMAGES - 1) * 2 - 1) * jnp.ones_like(pixels_x[:, None])
    x = pixels_x[:, None] / (IMG_W - 1) * 2 - 1
    y = pixels_y[:, None] / (IMG_H - 1) * 2 - 1
    inp = jnp.concatenate([cidx, x, y], axis=-1)
    h = jnp.maximum(jnp.dot(inp, w0, precision=hp) + b0, 0.0)
    h = jnp.maximum(jnp.dot(h, w1, precision=hp) + b1, 0.0)
    o = jax.nn.sigmoid(jnp.dot(h, w2, precision=hp) + b2)
    rgb, a = o[:, 0:3], o[:, 3:4]
    return (1.0 - a) * init_background_rgb.reshape(1, 3) + a * rgb


# --------------------------------- parameters ----------------------------------
def init_params(key):
    k0, k1, k2 = jax.random.split(key, 3)
    w0 = jax.random.normal(k0, (D_IN, D_HIDDEN), jnp.float32) * 0.5
    b0 = jnp.zeros((1, D_HIDDEN), jnp.float32)
    w1 = jax.random.normal(k1, (D_HIDDEN, D_HIDDEN), jnp.float32) * (1.0 / jnp.sqrt(D_HIDDEN))
    b1 = jnp.zeros((1, D_HIDDEN), jnp.float32)
    w2 = jax.random.normal(k2, (D_HIDDEN, D_OUT), jnp.float32) * (1.0 / jnp.sqrt(D_HIDDEN))
    b2 = jnp.zeros((1, D_OUT), jnp.float32)
    return (w0, b0, w1, b1, w2, b2)


if __name__ == "__main__":
    key = jax.random.PRNGKey(0)
    k_params, k_px, k_py = jax.random.split(key, 3)

    params = init_params(k_params)

    # Lane-aligned ray count: no wrapper padding; tile clamps to 2048 -> 2 'parallel'
    # grid steps (both v7x TensorCores get work). Coordinates are built feature-major.
    n_rays = 4096
    pixels_xy = jnp.concatenate(
        [jax.random.randint(k_px, (1, n_rays), 0, IMG_W),
         jax.random.randint(k_py, (1, n_rays), 0, IMG_H)], axis=0).astype(jnp.float32)
    camera_id = jnp.asarray(3, jnp.int32)
    init_background_rgb = jnp.array([1.0, 1.0, 1.0], jnp.float32)

    out_fm = neus_background_mlp(camera_id, pixels_xy, init_background_rgb, params)
    out_fm = jax.block_until_ready(out_fm)

    ref = neus_background_mlp_ref(camera_id, pixels_xy[0], pixels_xy[1],
                                  init_background_rgb, params)

    out = out_fm[:, :n_rays].T            # relayout only for the test comparison
    assert out.shape == (n_rays, 3)
    # bf16 MXU operands (f32 accumulate) -> relaxed tolerance vs the all-f32 reference.
    assert jnp.allclose(out, ref, atol=1e-2, rtol=1e-2), "mismatch vs reference"

    print("KERNEL_OK")
</pallas_src>

<mosaic_0001>
module attributes {stable_mosaic.version = 11 : i64} {
  func.func @_bg_mlp_kernel(%arg0: i32, %arg1: memref<1xi32, #tpu.memory_space<smem>>, %arg2: memref<3xf32, #tpu.memory_space<smem>>, %arg3: memref<2x2048xf32, #tpu.memory_space<vmem>>, %arg4: memref<32x1xf32, #tpu.memory_space<vmem>>, %arg5: memref<32x1xf32, #tpu.memory_space<vmem>>, %arg6: memref<32x1xf32, #tpu.memory_space<vmem>>, %arg7: memref<32x1xf32, #tpu.memory_space<vmem>>, %arg8: memref<32x32xbf16, #tpu.memory_space<vmem>>, %arg9: memref<32x1xf32, #tpu.memory_space<vmem>>, %arg10: memref<4x32xbf16, #tpu.memory_space<vmem>>, %arg11: memref<4x1xf32, #tpu.memory_space<vmem>>, %arg12: memref<3x2048xf32, #tpu.memory_space<vmem>>) attributes {dimension_semantics = [#tpu.dimension_semantics<parallel>], iteration_bounds = array<i64: 2>, scalar_prefetch = 2 : i64, scratch_operands = 0 : i64, tpu.core_type = #tpu.core_type<tc>, window_params = [{transform_indices = @transform_0, window_bounds = array<i64: 2, 2048>}, {pipeline_mode = #tpu.pipeline_mode<synchronous>, transform_indices = @transform_1, window_bounds = array<i64: 32, 1>}, {pipeline_mode = #tpu.pipeline_mode<synchronous>, transform_indices = @transform_2, window_bounds = array<i64: 32, 1>}, {pipeline_mode = #tpu.pipeline_mode<synchronous>, transform_indices = @transform_3, window_bounds = array<i64: 32, 1>}, {pipeline_mode = #tpu.pipeline_mode<synchronous>, transform_indices = @transform_4, window_bounds = array<i64: 32, 1>}, {pipeline_mode = #tpu.pipeline_mode<synchronous>, transform_indices = @transform_5, window_bounds = array<i64: 32, 32>}, {pipeline_mode = #tpu.pipeline_mode<synchronous>, transform_indices = @transform_6, window_bounds = array<i64: 32, 1>}, {pipeline_mode = #tpu.pipeline_mode<synchronous>, transform_indices = @transform_7, window_bounds = array<i64: 4, 32>}, {pipeline_mode = #tpu.pipeline_mode<synchronous>, transform_indices = @transform_8, window_bounds = array<i64: 4, 1>}, {transform_indices = @transform_9, window_bounds = array<i64: 3, 2048>}]} {
    %c0 = arith.constant 0 : index
    %0 = memref.load %arg1[%c0] : memref<1xi32, #tpu.memory_space<smem>>
    %1 = arith.sitofp %0 : i32 to f32
    %cst = arith.constant 7.000000e+00 : f32
    %2 = arith.divf %1, %cst : f32
    %cst_0 = arith.constant 2.000000e+00 : f32
    %3 = arith.mulf %2, %cst_0 : f32
    %cst_1 = arith.constant 1.000000e+00 : f32
    %4 = arith.subf %3, %cst_1 : f32
    %c0_2 = arith.constant 0 : index
    %c0_3 = arith.constant 0 : index
    %5 = vector.load %arg3[%c0_2, %c0_3] : memref<2x2048xf32, #tpu.memory_space<vmem>>, vector<1x2048xf32>
    %cst_4 = arith.constant 6.300000e+01 : f32
    %6 = vector.broadcast %cst_4 : f32 to vector<1x2048xf32>
    %7 = arith.divf %5, %6 : vector<1x2048xf32>
    %cst_5 = arith.constant 2.000000e+00 : f32
    %8 = vector.broadcast %cst_5 : f32 to vector<1x2048xf32>
    %9 = arith.mulf %7, %8 : vector<1x2048xf32>
    %cst_6 = arith.constant 1.000000e+00 : f32
    %10 = vector.broadcast %cst_6 : f32 to vector<1x2048xf32>
    %11 = arith.subf %9, %10 : vector<1x2048xf32>
    %c1 = arith.constant 1 : index
    %c0_7 = arith.constant 0 : index
    %12 = vector.load %arg3[%c1, %c0_7] : memref<2x2048xf32, #tpu.memory_space<vmem>>, vector<1x2048xf32>
    %cst_8 = arith.constant 4.700000e+01 : f32
    %13 = vector.broadcast %cst_8 : f32 to vector<1x2048xf32>
    %14 = arith.divf %12, %13 : vector<1x2048xf32>
    %cst_9 = arith.constant 2.000000e+00 : f32
    %15 = vector.broadcast %cst_9 : f32 to vector<1x2048xf32>
    %16 = arith.mulf %14, %15 : vector<1x2048xf32>
    %cst_10 = arith.constant 1.000000e+00 : f32
    %17 = vector.broadcast %cst_10 : f32 to vector<1x2048xf32>
    %18 = arith.subf %16, %17 : vector<1x2048xf32>
    %c0_11 = arith.constant 0 : index
    %c0_12 = arith.constant 0 : index
    %19 = vector.load %arg7[%c0_11, %c0_12] : memref<32x1xf32, #tpu.memory_space<vmem>>, vector<32x1xf32>
    %c0_13 = arith.constant 0 : index
    %c0_14 = arith.constant 0 : index
    %20 = vector.load %arg4[%c0_13, %c0_14] : memref<32x1xf32, #tpu.memory_space<vmem>>, vector<32x1xf32>
    %21 = vector.broadcast %4 : f32 to vector<32x1xf32>
    %22 = arith.mulf %21, %20 : vector<32x1xf32>
    %23 = arith.addf %19, %22 : vector<32x1xf32>
    %c0_15 = arith.constant 0 : index
    %c0_16 = arith.constant 0 : index
    %24 = vector.load %arg5[%c0_15, %c0_16] : memref<32x1xf32, #tpu.memory_space<vmem>>, vector<32x1xf32>
    %25 = vector.broadcast %24 : vector<32x1xf32> to vector<32x2048xf32>
    %26 = vector.broadcast %11 : vector<1x2048xf32> to vector<32x2048xf32>
    %27 = arith.mulf %25, %26 : vector<32x2048xf32>
    %c0_17 = arith.constant 0 : index
    %c0_18 = arith.constant 0 : index
    %28 = vector.load %arg6[%c0_17, %c0_18] : memref<32x1xf32, #tpu.memory_space<vmem>>, vector<32x1xf32>
    %29 = vector.broadcast %28 : vector<32x1xf32> to vector<32x2048xf32>
    %30 = vector.broadcast %18 : vector<1x2048xf32> to vector<32x2048xf32>
    %31 = arith.mulf %29, %30 : vector<32x2048xf32>
    %32 = arith.addf %27, %31 : vector<32x2048xf32>
    %33 = vector.broadcast %23 : vector<32x1xf32> to vector<32x2048xf32>
    %34 = arith.addf %32, %33 : vector<32x2048xf32>
    %cst_19 = arith.constant 0.000000e+00 : f32
    %35 = vector.broadcast %cst_19 : f32 to vector<32x2048xf32>
    %36 = arith.maximumf %34, %35 : vector<32x2048xf32>
    %c0_20 = arith.constant 0 : index
    %c0_21 = arith.constant 0 : index
    %37 = vector.load %arg8[%c0_20, %c0_21] : memref<32x32xbf16, #tpu.memory_space<vmem>>, vector<32x32xbf16>
    %38 = arith.truncf %36 : vector<32x2048xf32> to vector<32x2048xbf16>
    %cst_22 = arith.constant dense<0.000000e+00> : vector<32x2048xf32>
    %39 = tpu.matmul %37, %38, %cst_22 {dimension_numbers = #tpu.dot_dimension_numbers<[1], [0], [0], [1], [0, 0, 1, 1], [], []>} : vector<32x32xbf16>, vector<32x2048xbf16>, vector<32x2048xf32> -> vector<32x2048xf32>
    %c0_23 = arith.constant 0 : index
    %c0_24 = arith.constant 0 : index
    %40 = vector.load %arg9[%c0_23, %c0_24] : memref<32x1xf32, #tpu.memory_space<vmem>>, vector<32x1xf32>
    %41 = vector.broadcast %40 : vector<32x1xf32> to vector<32x2048xf32>
    %42 = arith.addf %39, %41 : vector<32x2048xf32>
    %cst_25 = arith.constant 0.000000e+00 : f32
    %43 = vector.broadcast %cst_25 : f32 to vector<32x2048xf32>
    %44 = arith.maximumf %42, %43 : vector<32x2048xf32>
    %c0_26 = arith.constant 0 : index
    %c0_27 = arith.constant 0 : index
    %45 = vector.load %arg10[%c0_26, %c0_27] : memref<4x32xbf16, #tpu.memory_space<vmem>>, vector<4x32xbf16>
    %46 = arith.truncf %44 : vector<32x2048xf32> to vector<32x2048xbf16>
    %cst_28 = arith.constant dense<0.000000e+00> : vector<4x2048xf32>
    %47 = tpu.matmul %45, %46, %cst_28 {dimension_numbers = #tpu.dot_dimension_numbers<[1], [0], [0], [1], [0, 0, 1, 1], [], []>} : vector<4x32xbf16>, vector<32x2048xbf16>, vector<4x2048xf32> -> vector<4x2048xf32>
    %c0_29 = arith.constant 0 : index
    %c0_30 = arith.constant 0 : index
    %48 = vector.load %arg11[%c0_29, %c0_30] : memref<4x1xf32, #tpu.memory_space<vmem>>, vector<4x1xf32>
    %49 = vector.broadcast %48 : vector<4x1xf32> to vector<4x2048xf32>
    %50 = arith.addf %47, %49 : vector<4x2048xf32>
    %51 = arith.negf %50 : vector<4x2048xf32>
    %52 = math.exp %51 : vector<4x2048xf32>
    %cst_31 = arith.constant 1.000000e+00 : f32
    %53 = vector.broadcast %cst_31 : f32 to vector<4x2048xf32>
    %54 = arith.addf %53, %52 : vector<4x2048xf32>
    %55 = arith.divf %53, %54 : vector<4x2048xf32>
    %56 = vector.extract_strided_slice %55 {offsets = [0, 0], sizes = [3, 2048], strides = [1, 1]} : vector<4x2048xf32> to vector<3x2048xf32>
    %57 = vector.extract_strided_slice %55 {offsets = [3, 0], sizes = [1, 2048], strides = [1, 1]} : vector<4x2048xf32> to vector<1x2048xf32>
    %58 = tpu.iota {dimensions = array<i32: 0>} : vector<3x1xi32>
    %c0_i32 = arith.constant 0 : i32
    %59 = vector.broadcast %c0_i32 : i32 to vector<3x1xi32>
    %60 = arith.cmpi eq, %58, %59 : vector<3x1xi32>
    %c0_32 = arith.constant 0 : index
    %61 = memref.load %arg2[%c0_32] : memref<3xf32, #tpu.memory_space<smem>>
    %c1_i32 = arith.constant 1 : i32
    %62 = vector.broadcast %c1_i32 : i32 to vector<3x1xi32>
    %63 = arith.cmpi eq, %58, %62 : vector<3x1xi32>
    %c1_33 = arith.constant 1 : index
    %64 = memref.load %arg2[%c1_33] : memref<3xf32, #tpu.memory_space<smem>>
    %c2 = arith.constant 2 : index
    %65 = memref.load %arg2[%c2] : memref<3xf32, #tpu.memory_space<smem>>
    %66 = vector.broadcast %64 : f32 to vector<3x1xf32>
    %67 = vector.broadcast %65 : f32 to vector<3x1xf32>
    %68 = arith.select %63, %66, %67 : vector<3x1xi1>, vector<3x1xf32>
    %69 = vector.broadcast %61 : f32 to vector<3x1xf32>
    %70 = arith.select %60, %69, %68 : vector<3x1xi1>, vector<3x1xf32>
    %71 = vector.broadcast %70 : vector<3x1xf32> to vector<3x2048xf32>
    %72 = arith.subf %56, %71 : vector<3x2048xf32>
    %73 = vector.broadcast %57 : vector<1x2048xf32> to vector<3x2048xf32>
    %74 = arith.mulf %73, %72 : vector<3x2048xf32>
    %75 = vector.broadcast %70 : vector<3x1xf32> to vector<3x2048xf32>
    %76 = arith.addf %75, %74 : vector<3x2048xf32>
    %c0_34 = arith.constant 0 : index
    %c0_35 = arith.constant 0 : index
    %77 = vector.load %arg12[%c0_34, %c0_35] : memref<3x2048xf32, #tpu.memory_space<vmem>>, vector<3x2048xf32>
    tpu.vector_store %arg12[%c0_34, %c0_35], %76 {strides = array<i32>} : memref<3x2048xf32, #tpu.memory_space<vmem>>, vector<3x2048xf32>,
    return
  }
  func.func @transform_0(%arg0: i32, %arg1: memref<1xi32, #tpu.memory_space<smem>>, %arg2: memref<3xf32, #tpu.memory_space<smem>>) -> (i32, i32) {
    %c0_i32 = arith.constant 0 : i32
    %c0_i32_0 = arith.constant 0 : i32
    return %c0_i32, %arg0 : i32, i32
  }
  func.func @transform_1(%arg0: i32, %arg1: memref<1xi32, #tpu.memory_space<smem>>, %arg2: memref<3xf32, #tpu.memory_space<smem>>) -> (i32, i32) {
    %c0_i32 = arith.constant 0 : i32
    %c0_i32_0 = arith.constant 0 : i32
    %c0_i32_1 = arith.constant 0 : i32
    return %c0_i32, %c0_i32_0 : i32, i32
  }
  func.func @transform_2(%arg0: i32, %arg1: memref<1xi32, #tpu.memory_space<smem>>, %arg2: memref<3xf32, #tpu.memory_space<smem>>) -> (i32, i32) {
    %c0_i32 = arith.constant 0 : i32
    %c0_i32_0 = arith.constant 0 : i32
    %c0_i32_1 = arith.constant 0 : i32
    return %c0_i32, %c0_i32_0 : i32, i32
  }
  func.func @transform_3(%arg0: i32, %arg1: memref<1xi32, #tpu.memory_space<smem>>, %arg2: memref<3xf32, #tpu.memory_space<smem>>) -> (i32, i32) {
    %c0_i32 = arith.constant 0 : i32
    %c0_i32_0 = arith.constant 0 : i32
    %c0_i32_1 = arith.constant 0 : i32
    return %c0_i32, %c0_i32_0 : i32, i32
  }
  func.func @transform_4(%arg0: i32, %arg1: memref<1xi32, #tpu.memory_space<smem>>, %arg2: memref<3xf32, #tpu.memory_space<smem>>) -> (i32, i32) {
    %c0_i32 = arith.constant 0 : i32
    %c0_i32_0 = arith.constant 0 : i32
    %c0_i32_1 = arith.constant 0 : i32
    return %c0_i32, %c0_i32_0 : i32, i32
  }
  func.func @transform_5(%arg0: i32, %arg1: memref<1xi32, #tpu.memory_space<smem>>, %arg2: memref<3xf32, #tpu.memory_space<smem>>) -> (i32, i32) {
    %c0_i32 = arith.constant 0 : i32
    %c0_i32_0 = arith.constant 0 : i32
    %c0_i32_1 = arith.constant 0 : i32
    return %c0_i32, %c0_i32_0 : i32, i32
  }
  func.func @transform_6(%arg0: i32, %arg1: memref<1xi32, #tpu.memory_space<smem>>, %arg2: memref<3xf32, #tpu.memory_space<smem>>) -> (i32, i32) {
    %c0_i32 = arith.constant 0 : i32
    %c0_i32_0 = arith.constant 0 : i32
    %c0_i32_1 = arith.constant 0 : i32
    return %c0_i32, %c0_i32_0 : i32, i32
  }
  func.func @transform_7(%arg0: i32, %arg1: memref<1xi32, #tpu.memory_space<smem>>, %arg2: memref<3xf32, #tpu.memory_space<smem>>) -> (i32, i32) {
    %c0_i32 = arith.constant 0 : i32
    %c0_i32_0 = arith.constant 0 : i32
    %c0_i32_1 = arith.constant 0 : i32
    return %c0_i32, %c0_i32_0 : i32, i32
  }
  func.func @transform_8(%arg0: i32, %arg1: memref<1xi32, #tpu.memory_space<smem>>, %arg2: memref<3xf32, #tpu.memory_space<smem>>) -> (i32, i32) {
    %c0_i32 = arith.constant 0 : i32
    %c0_i32_0 = arith.constant 0 : i32
    %c0_i32_1 = arith.constant 0 : i32
    return %c0_i32, %c0_i32_0 : i32, i32
  }
  func.func @transform_9(%arg0: i32, %arg1: memref<1xi32, #tpu.memory_space<smem>>, %arg2: memref<3xf32, #tpu.memory_space<smem>>) -> (i32, i32) {
    %c0_i32 = arith.constant 0 : i32
    %c0_i32_0 = arith.constant 0 : i32
    return %c0_i32, %arg0 : i32, i32
  }
}

</mosaic_0001>

<bundles_post_ra>
// kernel: tpu_custom_call.1
= control target key start
LH: loop header
LB: loop body
LE: loop exit
PB: predicated region body
PF: predicated region fallthrough
CT: control target
= control target key end

     0   :  { %s3381_s0 = inlined_call_operand.<no memory space> [shape: s32[1], index: 0, kind: input, shape index: {}]   ;;  %s3382_s1 = inlined_call_operand.vmem [shape: f32[3], index: 1, kind: input, shape index: {}]   ;;  %s3383_s2 = inlined_call_operand.vmem [shape: f32[2,4096], index: 2, kind: input, shape index: {}]   ;;  %s3384_s3 = inlined_call_operand.vmem [shape: f32[32,1], index: 3, kind: input, shape index: {}]   ;;  %s3385_s4 = inlined_call_operand.vmem [shape: f32[32,1], index: 4, kind: input, shape index: {}]   ;;  %s3386_s5 = inlined_call_operand.vmem [shape: f32[32,1], index: 5, kind: input, shape index: {}]   ;;  %s3387_s6 = inlined_call_operand.vmem [shape: f32[32,1], index: 6, kind: input, shape index: {}]   ;;  %s3388_s7 = inlined_call_operand.vmem [shape: bf16[32,32], index: 7, kind: input, shape index: {}]   ;;  %s3389_s8 = inlined_call_operand.vmem [shape: f32[32,1], index: 8, kind: input, shape index: {}]   ;;  %s3390_s9 = inlined_call_operand.vmem [shape: bf16[4,32], index: 9, kind: input, shape index: {}]   ;;  %s3391_s10 = inlined_call_operand.vmem [shape: f32[4,1], index: 10, kind: input, shape index: {}]   ;;  %s3392_s11 = inlined_call_operand.hbm [shape: f32[3,4096], index: 11, kind: output, shape index: {}]  }
   0x1   :  { %16 = sst [smem:[#allocation3]] %s3381_s0  ;;  %s17_s21 = sshll.u32 %s3382_s1, 4  ;;  %s18_s21 = int_to_ptr.vmem [resolvable:$true] %s17_s21 }
   0x2   :  { %s2384_s22 = scalar_lea.vmem %s18_s21, 16  ;;  %p2389_p1 = scmp.lt.s32.totalorder %s18_s21, %s18_s21 }
   0x3   :  { %p2385_p0 = scmp.ne.s32.totalorder %s18_s21, %s2384_s22  ;;  %p2390_p2 = scmp.lt.s32.totalorder %s2384_s22, %s2384_s22 }
   0x5   :  { %p2391_p3 = por %p2390_p2, %p2389_p1 }
   0x7   :  { %p2392_p4 = pnand %p2391_p3, %p2385_p0 }
   0x9   :  { %2395 = shalt.err (!%p2392_p4)  }
   0xa   :  { %s2460_s23 = smov [#allocation4]  }
   0xb   :  { %20 = dma.vmem_to_smem %s18_s21, 16, %s2460_s23, [#allocation2] }
   0xc   :  { %2438 = dma.done.wait [#allocation2], 16 }
   0xd   :  { %2439 = vsyncadd [#allocation2], 4294967280 }
   0xe   :  { %22 = sfence }
   0xf   :  { %23 = vsyncpa [#allocation6], 0 }
  0x10   :  { %25 = vsyncpa [#allocation6 + $0x1], 0  ;;  %s2529_s0 = smov 0   ;;  %s2531_s24 = smov 0  }
  0x11   :  { %s2533_s1 = smov 0   ;;  %s2535_s25 = smov 0  }
  0x12 LB: > { %s2550_s26 = sadd.s32 4294967295, %s2458_s25   ;;  %s2210_s27 = sadd.s32 4294967294, %s2458_s25   ;;  %s2458_s25 = sphi %s2535_s25, %s3463_s25   ;;  %s2454_s1 = sphi %s2533_s1, %s3462_s1   ;;  %s2450_s24 = sphi %s2531_s24, %s3461_s24   ;;  %s2446_s0 = sphi %s2529_s0, %s3460_s0  }
  0x13   : > { %s2554_s28 = sadd.s32 1, %s2458_s25   ;;  %s232_s29 = sadd.s32 1, %s2454_s1 }
  0x14   : > { %s229_s30 = ssub.s32 %s2458_s25, %s2554_s28  ;;  %p242_p5 = scmp.ne.s32.totalorder %s2454_s1, %s2450_s24 }
  0x15   : > { %p230_p6 = scmp.eq.s32.totalorder %s229_s30, 0  ;;  %p243_p7 = scmp.eq.s32.totalorder %s2550_s26, 1 }
  0x16   : > { %p248_p8 = scmp.ne.s32.totalorder %s2450_s24, %s2446_s0  ;;  %p249_p9 = scmp.eq.s32.totalorder %s2210_s27, 1 }
  0x17   : > { %s2565_s12 = scalar_select %p230_p6, %s2454_s1, %s232_s29  }
  0x18   : > { %p2567_p10 = por %p243_p7, %p242_p5  ;;  %p2571_p11 = por %p249_p9, %p248_p8 }
  0x19   : > { %3417 = sst [smem:[#allocation9_spill]] %s2565_s12  ;;  %p2213_p12 = scmp.ge.s32.totalorder %s2458_s25, 1 }
  0x1a   : > { %p300_p13 = scmp.lt.s32.totalorder %s2458_s25, 3 }
  0x1c   : > { %p301_p0 = pnand %p2213_p12, %p300_p13 }
  0x1e   : > { %304 = sbr.rel (%p301_p0) target bundleno = 730 (0x2da), region = 56 }
  0x23   : > { %v561_v0 = vld [vmem:[%s3386_s5 + $0x10] sm:$0xff]  ;;  %s344_s19 = sld [smem:[#allocation3]]  ;;  %v3393_v2 = vmov 0   ;;  %v562_v3 = vld [vmem:[%s3386_s5 + $0x18] sm:$0xff]  ;;  %v390_v5 = vld [vmem:[%s3385_s4 + $0x8] sm:$0xff]  ;;  %s2215_s27 = sshll.u32 %s2550_s26, 4  ;;  %v415_v35 = vlaneseq }
  0x24   : > { %v391_v1 = vld [vmem:[%s3385_s4 + $0x10] sm:$0xff]  ;;  %2317 = vset.pattern.permute.xlu1 %v3393_v2  ;;  %2316 = vset.pattern.permute.xlu0 %v3393_v2  ;;  %v392_v4 = vld [vmem:[%s3385_s4 + $0x18] sm:$0xff]  ;;  %v389_v6 = vld [vmem:[%s3385_s4] sm:$0xff]  ;;  %p337_p1 = scmp.lt.s32.totalorder %s2215_s27, 31  ;;  %vm1011_vm0 = vcmask 261120   ;;  %s3264_s23 = sld [smem:[#allocation4 + $0x2]] }
  0x25   : > { %575 = vperm.xlu1 %2317, %v561_v0   ;;  %405 = vperm.xlu0 %2316, %v391_v1   ;;  %v560_v7 = vld [vmem:[%s3386_s5 + $0x8] sm:$0xff]  ;;  %v559_v8 = vld [vmem:[%s3386_s5] sm:$0xff]  ;;  %v379_v9 = vld [vmem:[%s3384_s3 + $0x18] sm:$0xff]  ;;  %v2648_v40 = vshrl.u32 %v415_v35, 7 }
  0x26   : > { %1050 = vmatprep.mubr.bf16.mxu0 %v3393_v2  ;;  %1103 = vmatprep.mubr.bf16.mxu1 %v3393_v2  ;;  %v378_v10 = vld [vmem:[%s3384_s3 + $0x10] sm:$0xff]  ;;  %v377_v11 = vld [vmem:[%s3384_s3 + $0x8] sm:$0xff]  ;;  %v376_v12 = vld [vmem:[%s3384_s3] sm:$0xff]  ;;  %s3465_s27 = smov (!%p337_p1, %s2215_s27), 31 }
  0x27   : > { %v375_v13 = vld [vmem:[%s3387_s6 + $0x18] sm:$0xff]  ;;  %v374_v15 = vld [vmem:[%s3387_s6 + $0x10] sm:$0xff]  ;;  %v373_v20 = vld [vmem:[%s3387_s6 + $0x8] sm:$0xff]  ;;  %s2216_s29 = sshll.u32 %s3465_s27, 1  ;;  %3420 = vst [vmem:[#allocation10_spill] sm:$0xff] %v2648_v40  ;;  %v421_v45 = vsub.s32 1, %v2648_v40 }
  0x28   : > { %v372_v21 = vld [vmem:[%s3387_s6] sm:$0xff]  ;;  %v980_v26 = vld [vmem:[%s3389_s8 + $0x18] sm:$0xff]  ;;  %v979_v27 = vld [vmem:[%s3389_s8 + $0x10] sm:$0xff]  ;;  %v2652_v46 = vsub.s32 3, %v2648_v40  ;;  %v417_v49 = vsub.s32 0, %v2648_v40  ;;  %v425_v50 = vsub.s32 2, %v2648_v40 }
  0x29   : > { %580 = vperm.xlu1 %2317, %v562_v3   ;;  %410 = vperm.xlu0 %2316, %v392_v4   ;;  %s345_s30 = scvt.s32.f32 %s344_s19  ;;  %v978_v28 = vld [vmem:[%s3389_s8 + $0x8] sm:$0xff]  ;;  %v977_v29 = vld [vmem:[%s3389_s8] sm:$0xff]  ;;  %v437_v51 = vsub.s32 5, %v2648_v40  ;;  %v445_v52 = vsub.s32 7, %v2648_v40  ;;  %v433_v55 = vsub.s32 4, %v2648_v40  ;;  %v441_v56 = vsub.s32 6, %v2648_v40 }
  0x2a   : > { %v1539_v30 = vld [vmem:[%s3391_s10] sm:$0xf]  ;;  %3421 = vst [vmem:[#allocation11_spill] sm:$0xff] %v2652_v46  ;;  %s1975_s27 = sld [smem:[#allocation4]] }
  0x2b   : > { %s348_s17 = smul.f32 0.14285715, %s345_s30  ;;  %s340_s30 = scalar_lea.vmem %s3383_s2, %s2216_s29 }
  0x2c   : > { %v351_v31 = vld [vmem:[%s340_s30] ss:$2 sm:$0xff]  ;;  %v2221_v32 = vld [vmem:[%s340_s30 + $0x1] ss:$2 sm:$0xff]  ;;  %v2218_v36 = vld [vmem:[%s340_s30 + $0x10] ss:$2 sm:$0xff] }
  0x2d   : > { %400 = vperm.xlu1 %2317, %v390_v5   ;;  %395 = vperm.xlu0 %2316, %v389_v6   ;;  %s349_s18 = smul.f32 2.0, %s348_s17  ;;  %v355_v33 = vmul.f32 0.015873017, %v351_v31  ;;  %v366_v34 = vmul.f32 0.021276595, %v2221_v32  ;;  %s333_s29 = sand.u32 1, %s2450_s24  }
  0x2e   : > { %v2222_v37 = vld [vmem:[%s340_s30 + $0x11] ss:$2 sm:$0xff]  ;;  %v356_v41 = vmul.f32 0.015873017, %v2218_v36  ;;  %s2214_s15 = sshll.u32 %s333_s29, 6  ;;  %s2274_s30 = sshll.u32 %s2550_s26, 10 }
  0x2f   : > { %s2217_s19 = sadd.f32 -1.0, %s349_s18  ;;  %v357_v38 = vmul.f32 2.0, %v355_v33  ;;  %v368_v39 = vmul.f32 2.0, %v366_v34  ;;  %v367_v42 = vmul.f32 0.021276595, %v2222_v37  ;;  %s2149_s21 = scalar_lea.hbm %s3392_s11, %s2274_s30 }
  0x30   : > { %v358_v47 = vmul.f32 2.0, %v356_v41  ;;  %s3262_s18 = sld [smem:[#allocation4 + $0x1]]  ;;  %s2137_s22 = scalar_lea.sflag [#allocation6], %s333_s29 }
  0x31   : > { %570 = vperm.xlu1 %2317, %v560_v7   ;;  %565 = vperm.xlu0 %2316, %v559_v8   ;;  %v380_v14 = vstv %s2217_s19  ;;  %v2219_v43 = vadd.f32 -1.0, %v357_v38  ;;  %v2223_v44 = vadd.f32 -1.0, %v368_v39  ;;  %v369_v48 = vmul.f32 2.0, %v367_v42  ;;  %s3292_s19 = scalar_lea.vmem [#allocation5], %s2214_s15  ;;  %s2462_s26 = smov [#allocation5]  }
  0x32   : > { %v384_v16 = vmul.f32 %v380_v14, %v379_v9  ;;  %v383_v17 = vmul.f32 %v380_v14, %v378_v10  ;;  %v382_v18 = vmul.f32 %v380_v14, %v377_v11  ;;  %v381_v19 = vmul.f32 %v380_v14, %v376_v12  ;;  %s2151_s16 = sshll.u32 %s3292_s19, 4  ;;  %s2152_s16 = int_to_ptr.vmem [resolvable:$true] %s2151_s16 }
  0x33   : > { %v2658_v53 = vrot.slane %v2219_v43, %v421_v45  ;;  %v2660_v54 = vrot.slane %v2223_v44, %v421_v45  ;;  %v2665_v57 = vrot.slane %v2219_v43, %v2652_v46  ;;  %v2668_v58 = vrot.slane %v2223_v44, %v2652_v46  ;;  %s2396_s12 = scalar_lea.vmem %s2152_s16, 1024 }
  0x34   : > { %v388_v22 = vadd.f32 %v384_v16, %v375_v13  ;;  %v387_v23 = vadd.f32 %v383_v17, %v374_v15  ;;  %v386_v24 = vadd.f32 %v382_v18, %v373_v20  ;;  %v385_v25 = vadd.f32 %v381_v19, %v372_v21  ;;  %p2397_p2 = scmp.ne.s32.totalorder %s2152_s16, %s2396_s12 }
  0x35   : > { %v2220_v59 = vadd.f32 -1.0, %v358_v47  ;;  %v2224_v60 = vadd.f32 -1.0, %v369_v48  ;;  %v2670_v61 = vrot.slane %v2219_v43, %v417_v49  ;;  %v2672_v62 = vrot.slane %v2223_v44, %v417_v49 }
  0x36   : > { %810 = vperm.xlu1 %2317, %v388_v22   ;;  %805 = vperm.xlu0 %2316, %v387_v23   ;;  %v2674_v63 = vrot.slane %v2219_v43, %v425_v50  ;;  %v2676_v0 = vrot.slane %v2223_v44, %v425_v50  ;;  %v2678_v1 = vrot.slane %v2219_v43, %v437_v51  ;;  %p2398_p3 = pnand %p2397_p2, %p2567_p10 }
  0x37   : > { %v2680_v3 = vrot.slane %v2223_v44, %v437_v51  ;;  %v2682_v4 = vrot.slane %v2219_v43, %v445_v52  ;;  %v2684_v5 = vrot.slane %v2223_v44, %v445_v52  ;;  %v2686_v6 = vrot.slane %v2219_v43, %v433_v55 }
  0x38   : > { %v2688_v7 = vrot.slane %v2223_v44, %v433_v55  ;;  %v2690_v8 = vrot.slane %v2219_v43, %v441_v56  ;;  %v2692_v9 = vrot.slane %v2223_v44, %v441_v56  ;;  %v2694_v10 = vrot.slane %v2220_v59, %v421_v45  ;;  %p2399_p4 = pneg %p2398_p3 }
  0x39   : > { %v2696_v11 = vrot.slane %v2224_v60, %v421_v45  ;;  %v2699_v12 = vrot.slane %v2220_v59, %v2652_v46  ;;  %v2702_v13 = vrot.slane %v2224_v60, %v2652_v46  ;;  %v2704_v14 = vrot.slane %v2220_v59, %v417_v49 }
  0x3a   : > { %800 = vperm.xlu1 %2317, %v386_v24   ;;  %795 = vperm.xlu0 %2316, %v385_v25   ;;  %3422 = vst [vmem:[#allocation12_spill] sm:$0xff] %v2694_v10  ;;  %v2706_v15 = vrot.slane %v2224_v60, %v417_v49  ;;  %v2708_v16 = vrot.slane %v2220_v59, %v425_v50 }
  0x3b   : > { %3423 = vst [vmem:[#allocation13_spill] sm:$0xff] %v2696_v11  ;;  %3424 = vst [vmem:[#allocation14_spill] sm:$0xff] %v2699_v12  ;;  %v2710_v17 = vrot.slane %v2224_v60, %v425_v50  ;;  %v2712_v18 = vrot.slane %v2220_v59, %v437_v51  ;;  %v2714_v19 = vrot.slane %v2224_v60, %v437_v51 }
  0x3c   : > { %3425 = vst [vmem:[#allocation15_spill] sm:$0xff] %v2702_v13  ;;  %3426 = vst [vmem:[#allocation16_spill] sm:$0xff] %v2704_v14  ;;  %v2716_v20 = vrot.slane %v2220_v59, %v445_v52  ;;  %v2718_v21 = vrot.slane %v2224_v60, %v445_v52  ;;  %v2724_v24 = vrot.slane %v2220_v59, %v433_v55 }
  0x3d   : > { %3427 = vst [vmem:[#allocation17_spill] sm:$0xff] %v2706_v15  ;;  %3428 = vst [vmem:[#allocation18_spill] sm:$0xff] %v2708_v16  ;;  %v2726_v25 = vrot.slane %v2224_v60, %v433_v55 }
  0x3e   : > { %998 = vperm.xlu1 %2317, %v980_v26   ;;  %993 = vperm.xlu0 %2316, %v979_v27   ;;  %3429 = vst [vmem:[#allocation19_spill] sm:$0xff] %v2710_v17  ;;  %3430 = vst [vmem:[#allocation20_spill] sm:$0xff] %v2712_v18  ;;  %v2728_v26 = vrot.slane %v2220_v59, %v441_v56  ;;  %v2730_v27 = vrot.slane %v2224_v60, %v441_v56 }
  0x3f   : > { %3431 = vst [vmem:[#allocation21_spill] sm:$0xff] %v2714_v19  ;;  %3432 = vst [vmem:[#allocation22_spill] sm:$0xff] %v2716_v20 }
  0x40   : > { %3433 = vst [vmem:[#allocation23_spill] sm:$0xff] %v2718_v21  ;;  %3435 = vst [vmem:[#allocation25_spill] sm:$0xff] %v2724_v24 }
  0x41   : > { %3436 = vst [vmem:[#allocation26_spill] sm:$0xff] %v2726_v25  ;;  %3437 = vst [vmem:[#allocation27_spill] sm:$0xff] %v2728_v26 }
  0x42   : > { %988 = vperm.xlu1 %2317, %v978_v28   ;;  %983 = vperm.xlu0 %2316, %v977_v29   ;;  %3438 = vst [vmem:[#allocation28_spill] sm:$0xff] %v2730_v27 }
  0x46   : > { %1542 = vperm.xlu0 %2316, %v1539_v30  }
  0xa0   : > { %v2720_v22 = vpop.permute.xlu1 %575  ;;  %v2722_v23 = vpop.permute.xlu0 %405 }
  0xa1   : > { %3434 = vst [vmem:[#allocation24_spill] sm:$0xff] %v2722_v23  ;;  %v528_v28 = vmul.f32 %v2658_v53, %v2722_v23  ;;  %v698_v29 = vmul.f32 %v2660_v54, %v2720_v22  ;;  %v530_v30 = vmul.f32 %v2665_v57, %v2722_v23  ;;  %v700_v31 = vmul.f32 %v2668_v58, %v2720_v22 }
  0xa2   : > { %v527_v32 = vmul.f32 %v2670_v61, %v2722_v23  ;;  %v697_v33 = vmul.f32 %v2672_v62, %v2720_v22  ;;  %v529_v34 = vmul.f32 %v2674_v63, %v2722_v23  ;;  %v699_v35 = vmul.f32 %v2676_v0, %v2720_v22 }
  0xa3   : > { %v2748_v36 = vadd.f32 %v698_v29, %v528_v28  ;;  %v2750_v37 = vadd.f32 %v700_v31, %v530_v30  ;;  %v532_v38 = vmul.f32 %v2678_v1, %v2722_v23  ;;  %v702_v39 = vmul.f32 %v2680_v3, %v2720_v22 }
  0xa4   : > { %v2756_v41 = vpop.permute.xlu1 %580  ;;  %v2758_v42 = vpop.permute.xlu0 %410  ;;  %v2760_v43 = vadd.f32 %v697_v33, %v527_v32  ;;  %v2762_v44 = vadd.f32 %v699_v35, %v529_v34  ;;  %v534_v45 = vmul.f32 %v2682_v4, %v2722_v23  ;;  %v704_v47 = vmul.f32 %v2684_v5, %v2720_v22 }
  0xa5   : > { %v544_v48 = vmul.f32 %v2658_v53, %v2758_v42  ;;  %v714_v49 = vmul.f32 %v2660_v54, %v2756_v41  ;;  %v546_v50 = vmul.f32 %v2665_v57, %v2758_v42  ;;  %v716_v51 = vmul.f32 %v2668_v58, %v2756_v41 }
  0xa6   : > { %v543_v52 = vmul.f32 %v2670_v61, %v2758_v42  ;;  %v713_v55 = vmul.f32 %v2672_v62, %v2756_v41  ;;  %v545_v56 = vmul.f32 %v2674_v63, %v2758_v42  ;;  %v715_v59 = vmul.f32 %v2676_v0, %v2756_v41 }
  0xa7   : > { %v778_v60 = vadd.f32 %v714_v49, %v544_v48  ;;  %v780_v28 = vadd.f32 %v716_v51, %v546_v50  ;;  %v548_v29 = vmul.f32 %v2678_v1, %v2758_v42  ;;  %v718_v30 = vmul.f32 %v2680_v3, %v2756_v41 }
  0xa8   : > { %v2788_v31 = vpop.permute.xlu1 %400  ;;  %v2790_v32 = vpop.permute.xlu0 %395  ;;  %v777_v33 = vadd.f32 %v713_v55, %v543_v52  ;;  %v779_v34 = vadd.f32 %v715_v59, %v545_v56  ;;  %v2792_v35 = vadd.f32 %v702_v39, %v532_v38  ;;  %v550_v2 = vmul.f32 %v2682_v4, %v2758_v42 }
  0xa9   : > { %v496_v48 = vmul.f32 %v2658_v53, %v2790_v32  ;;  %v512_v49 = vmul.f32 %v2658_v53, %v2788_v31  ;;  %v498_v50 = vmul.f32 %v2665_v57, %v2790_v32  ;;  %v514_v51 = vmul.f32 %v2665_v57, %v2788_v31 }
  0xaa   : > { %v495_v52 = vmul.f32 %v2670_v61, %v2790_v32  ;;  %v511_v38 = vmul.f32 %v2670_v61, %v2788_v31  ;;  %v497_v39 = vmul.f32 %v2674_v63, %v2790_v32  ;;  %v513_v55 = vmul.f32 %v2674_v63, %v2788_v31 }
  0xab   : > { %v2812_v56 = vadd.f32 %v718_v30, %v548_v29  ;;  %v720_v53 = vmul.f32 %v2684_v5, %v2756_v41  ;;  %v2816_v59 = vadd.f32 %v704_v47, %v534_v45  ;;  %v531_v57 = vmul.f32 %v2686_v6, %v2722_v23 }
  0xac   : > { %v2820_v46 = vpop.permute.xlu1 %570  ;;  %v2822_v40 = vpop.permute.xlu0 %565  ;;  %v547_v61 = vmul.f32 %v2686_v6, %v2758_v42  ;;  %v701_v63 = vmul.f32 %v2688_v7, %v2720_v22  ;;  %v717_v29 = vmul.f32 %v2688_v7, %v2756_v41  ;;  %v2832_v45 = vmul.f32 %v2690_v8, %v2722_v23 }
  0xad   : > { %v666_v47 = vmul.f32 %v2660_v54, %v2822_v40  ;;  %v682_v30 = vmul.f32 %v2660_v54, %v2820_v46  ;;  %v668_v27 = vmul.f32 %v2668_v58, %v2822_v40  ;;  %v684_v26 = vmul.f32 %v2668_v58, %v2820_v46 }
  0xae   : > { %v665_v25 = vmul.f32 %v2672_v62, %v2822_v40  ;;  %v681_v24 = vmul.f32 %v2672_v62, %v2820_v46  ;;  %v667_v21 = vmul.f32 %v2676_v0, %v2822_v40  ;;  %v683_v20 = vmul.f32 %v2676_v0, %v2820_v46 }
  0xaf   : > { %v730_v19 = vadd.f32 %v666_v47, %v496_v48  ;;  %v746_v54 = vadd.f32 %v682_v30, %v512_v49  ;;  %v732_v18 = vadd.f32 %v668_v27, %v498_v50  ;;  %v748_v17 = vadd.f32 %v684_v26, %v514_v51 }
  0xb0   : > { %v729_v16 = vadd.f32 %v665_v25, %v495_v52  ;;  %v745_v15 = vadd.f32 %v681_v24, %v511_v38  ;;  %v731_v14 = vadd.f32 %v667_v21, %v497_v39  ;;  %v747_v58 = vadd.f32 %v683_v20, %v513_v55 }
  0xb1   : > { %v2850_v13 = vpop.permute.xlu1 %810  ;;  %v2852_v12 = vpop.permute.xlu0 %805  ;;  %v784_v11 = vadd.f32 %v720_v53, %v550_v2  ;;  %v765_v62 = vadd.f32 %v701_v63, %v531_v57  ;;  %v781_v10 = vadd.f32 %v717_v29, %v547_v61  ;;  %v2856_v23 = vmul.f32 %v2690_v8, %v2758_v42 }
  0xb2   : > { %v846_v0 = vadd.f32 %v2852_v12, %v2748_v36  ;;  %v862_v26 = vadd.f32 %v2850_v13, %v778_v60  ;;  %v848_v21 = vadd.f32 %v2852_v12, %v2750_v37  ;;  %v864_v20 = vadd.f32 %v2850_v13, %v780_v28 }
  0xb3   : > { %v845_v24 = vadd.f32 %v2852_v12, %v2760_v43  ;;  %v861_v2 = vadd.f32 %v2850_v13, %v777_v33  ;;  %v847_v25 = vadd.f32 %v2852_v12, %v2762_v44  ;;  %v863_v27 = vadd.f32 %v2850_v13, %v779_v34 }
  0xb4   : > { %v910_v48 = vmax.f32 %v846_v0, 0.0  ;;  %v926_v49 = vmax.f32 %v862_v26, 0.0  ;;  %v912_v36 = vmax.f32 %v848_v21, 0.0  ;;  %v928_v50 = vmax.f32 %v864_v20, 0.0 }
  0xb5   : > { %v2870_v60 = vpop.permute.xlu1 %800  ;;  %v2872_v51 = vpop.permute.xlu0 %795  ;;  %v909_v37 = vmax.f32 %v845_v24, 0.0  ;;  %v925_v28 = vmax.f32 %v861_v2, 0.0  ;;  %v911_v52 = vmax.f32 %v847_v25, 0.0  ;;  %v927_v38 = vmax.f32 %v863_v27, 0.0 }
  0xb6   : > { %v962_v43 = vpack.c.bf16 %v926_v49, %v910_v48  ;;  %v964_v39 = vpack.c.bf16 %v928_v50, %v912_v36  ;;  %v814_v33 = vadd.f32 %v2872_v51, %v730_v19  ;;  %v830_v44 = vadd.f32 %v2870_v60, %v746_v54 }
  0xb7   : > { %v961_v34 = vpack.c.bf16 %v925_v28, %v909_v37  ;;  %v963_v55 = vpack.c.bf16 %v927_v38, %v911_v52  ;;  %v816_v53 = vadd.f32 %v2872_v51, %v732_v18  ;;  %v832_v57 = vadd.f32 %v2870_v60, %v748_v17 }
  0xb8   : > { %1030 = vmatprep.subr.bf16.mxu0 %v962_v43  ;;  %1083 = vmatprep.subr.bf16.mxu1 %v964_v39  ;;  %v878_v61 = vmax.f32 %v814_v33, 0.0  ;;  %v894_v63 = vmax.f32 %v830_v44, 0.0  ;;  %v813_v29 = vadd.f32 %v2872_v51, %v729_v16  ;;  %v829_v47 = vadd.f32 %v2870_v60, %v745_v15 }
  0xb9   : > { %1031 = vmatpush1.bf16.msra.mxu0 %v961_v34  ;;  %1084 = vmatpush1.bf16.msra.mxu1 %v963_v55  ;;  %v880_v19 = vmax.f32 %v816_v53, 0.0  ;;  %v896_v30 = vmax.f32 %v832_v57, 0.0  ;;  %v815_v54 = vadd.f32 %v2872_v51, %v731_v14  ;;  %v831_v0 = vadd.f32 %v2870_v60, %v747_v58 }
  0xba   : > { %v946_v26 = vpack.c.bf16 %v894_v63, %v878_v61  ;;  %v877_v18 = vmax.f32 %v813_v29, 0.0  ;;  %v893_v21 = vmax.f32 %v829_v47, 0.0  ;;  %v850_v17 = vadd.f32 %v2852_v12, %v2792_v35  ;;  %v2892_v35 = vld [vmem:[%s3388_s7] sm:$0xff]  }
  0xbb   : > { %v948_v20 = vpack.c.bf16 %v896_v30, %v880_v19  ;;  %v879_v24 = vmax.f32 %v815_v54, 0.0  ;;  %v895_v2 = vmax.f32 %v831_v0, 0.0  ;;  %v866_v15 = vadd.f32 %v2850_v13, %v2812_v56 }
  0xbc   : > { %1032 = vmatprep.subr.bf16.mxu0 %v946_v26  ;;  %v945_v16 = vpack.c.bf16 %v893_v21, %v877_v18  ;;  %v914_v25 = vmax.f32 %v850_v17, 0.0  ;;  %v852_v14 = vadd.f32 %v2852_v12, %v2816_v59  ;;  %v868_v58 = vadd.f32 %v2850_v13, %v784_v11  ;;  %v2935_v26 = vld [vmem:[%s3388_s7 + $0x8] sm:$0xff]  }
  0xbd   : > { %1085 = vmatprep.subr.bf16.mxu1 %v948_v20  ;;  %v947_v27 = vpack.c.bf16 %v895_v2, %v879_v24  ;;  %v930_v48 = vmax.f32 %v866_v15, 0.0  ;;  %v849_v49 = vadd.f32 %v2852_v12, %v765_v62  ;;  %v865_v56 = vadd.f32 %v2850_v13, %v781_v10 }
  0xbe   : > { %1033 = vmatpush1.bf16.msra.mxu0 %v945_v16  ;;  %v916_v36 = vmax.f32 %v852_v14, 0.0  ;;  %v932_v50 = vmax.f32 %v868_v58, 0.0  ;;  %v703_v59 = vmul.f32 %v2692_v9, %v2720_v22  ;;  %v719_v11 = vmul.f32 %v2692_v9, %v2756_v41 }
  0xbf   : > { %1086 = vmatpush1.bf16.msra.mxu1 %v947_v27  ;;  %v966_v37 = vpack.c.bf16 %v930_v48, %v914_v25  ;;  %v913_v28 = vmax.f32 %v849_v49, 0.0  ;;  %v929_v52 = vmax.f32 %v865_v56, 0.0  ;;  %v500_v38 = vmul.f32 %v2678_v1, %v2790_v32 }
  0xc0   : > { %v968_v43 = vpack.c.bf16 %v932_v50, %v916_v36  ;;  %v767_v62 = vadd.f32 %v703_v59, %v2832_v45  ;;  %v783_v10 = vadd.f32 %v719_v11, %v2856_v23  ;;  %v516_v39 = vmul.f32 %v2678_v1, %v2788_v31  ;;  %v3440_v50 = vld [vmem:[#allocation24_spill] sm:$0xff] }
  0xc1   : > { %1136 = vmatprep.subr.bf16.mxu0 %v966_v37  ;;  %2227 = vmatmul.mubr.msk.bf16.vlgmr.msra.gmra.mxu0 %vm1011_vm0, %v2892_v35  ;;  %v965_v33 = vpack.c.bf16 %v929_v52, %v913_v28  ;;  %v670_v44 = vmul.f32 %v2680_v3, %v2822_v40  ;;  %v686_v34 = vmul.f32 %v2680_v3, %v2820_v46  ;;  %v3439_v19 = vmov 0   ;;  %v3441_v59 = vld [vmem:[#allocation12_spill] sm:$0xff]  ;;  %v3442_v28 = vld [vmem:[#allocation13_spill] sm:$0xff] }
  0xc2   : > { %1189 = vmatprep.subr.bf16.mxu1 %v968_v43  ;;  %2229 = vmatmul.mubr.msk.bf16.vlgmr.msra.gmra.mxu1 %vm1011_vm0, %v2892_v35  ;;  %v851_v23 = vadd.f32 %v2852_v12, %v767_v62  ;;  %v867_v45 = vadd.f32 %v2850_v13, %v783_v10  ;;  %v502_v1 = vmul.f32 %v2682_v4, %v2790_v32 }
  0xc3   : > { %1137 = vmatpush1.bf16.msra.mxu0 %v965_v33  ;;  %v734_v55 = vadd.f32 %v670_v44, %v500_v38  ;;  %v750_v53 = vadd.f32 %v686_v34, %v516_v39  ;;  %v518_v57 = vmul.f32 %v2682_v4, %v2788_v31  ;;  %v672_v3 = vmul.f32 %v2684_v5, %v2822_v40  ;;  %v3443_v34 = vld [vmem:[#allocation14_spill] sm:$0xff] }
  0xc4   : > { %v915_v61 = vmax.f32 %v851_v23, 0.0  ;;  %v931_v63 = vmax.f32 %v867_v45, 0.0  ;;  %v688_v29 = vmul.f32 %v2684_v5, %v2820_v46  ;;  %v499_v47 = vmul.f32 %v2686_v6, %v2790_v32  ;;  %1060 = vmatprep.mubr.bf16.mxu0 %v3439_v19  ;;  %1113 = vmatprep.mubr.bf16.mxu1 %v3439_v19 }
  0xc5   : > { %v818_v30 = vadd.f32 %v2872_v51, %v734_v55  ;;  %v834_v54 = vadd.f32 %v2870_v60, %v750_v53  ;;  %v736_v4 = vadd.f32 %v672_v3, %v502_v1  ;;  %v515_v0 = vmul.f32 %v2686_v6, %v2788_v31  ;;  %v3444_v53 = vld [vmem:[#allocation15_spill] sm:$0xff] }
  0xc6   : > { %v967_v5 = vpack.c.bf16 %v931_v63, %v915_v61  ;;  %v752_v18 = vadd.f32 %v688_v29, %v518_v57  ;;  %v669_v21 = vmul.f32 %v2688_v7, %v2822_v40  ;;  %v685_v17 = vmul.f32 %v2688_v7, %v2820_v46 }
  0xc7   : > { %v882_v20 = vmax.f32 %v818_v30, 0.0  ;;  %v898_v24 = vmax.f32 %v834_v54, 0.0  ;;  %v820_v2 = vadd.f32 %v2872_v51, %v736_v4  ;;  %v501_v6 = vmul.f32 %v2690_v8, %v2790_v32  ;;  %v3445_v54 = vld [vmem:[#allocation16_spill] sm:$0xff] }
  0xc8   : > { %1190 = vmatpush1.bf16.msra.mxu1 %v967_v5  ;;  %v836_v15 = vadd.f32 %v2870_v60, %v752_v18  ;;  %v733_v16 = vadd.f32 %v669_v21, %v499_v47  ;;  %v749_v25 = vadd.f32 %v685_v17, %v515_v0  ;;  %v517_v14 = vmul.f32 %v2690_v8, %v2788_v31  ;;  %v3446_v17 = vld [vmem:[#allocation17_spill] sm:$0xff] }
  0xc9   : > { %v950_v58 = vpack.c.bf16 %v898_v24, %v882_v20  ;;  %v884_v27 = vmax.f32 %v820_v2, 0.0  ;;  %v671_v7 = vmul.f32 %v2692_v9, %v2822_v40  ;;  %v687_v48 = vmul.f32 %v2692_v9, %v2820_v46  ;;  %2228 = vmatmul.mubr.msk.bf16.gmra.mxu0 %vm1011_vm0, %v2935_v26 }
  0xca   : > { %v900_v49 = vmax.f32 %v836_v15, 0.0  ;;  %v817_v56 = vadd.f32 %v2872_v51, %v733_v16  ;;  %v833_v36 = vadd.f32 %v2870_v60, %v749_v25  ;;  %v536_v11 = vmul.f32 %v3441_v59, %v3440_v50  ;;  %2230 = vmatmul.mubr.msk.bf16.gmra.mxu1 %vm1011_vm0, %v2935_v26  ;;  %1156 = vmatprep.mubr.bf16.mxu0 %v3439_v19  ;;  %v3447_v15 = vld [vmem:[#allocation18_spill] sm:$0xff] }
  0xcb   : > { %1138 = vmatprep.subr.bf16.mxu0 %v950_v58  ;;  %v735_v8 = vadd.f32 %v671_v7, %v501_v6  ;;  %v751_v37 = vadd.f32 %v687_v48, %v517_v14  ;;  %v552_v9 = vmul.f32 %v3441_v59, %v2758_v42  ;;  %v706_v52 = vmul.f32 %v3442_v28, %v2720_v22 }
  0xcc   : > { %v952_v38 = vpack.c.bf16 %v900_v49, %v884_v27  ;;  %v881_v43 = vmax.f32 %v817_v56, 0.0  ;;  %v897_v62 = vmax.f32 %v833_v36, 0.0  ;;  %v722_v10 = vmul.f32 %v3442_v28, %v2756_v41  ;;  %1209 = vmatprep.mubr.bf16.mxu1 %v3439_v19  ;;  %v3448_v49 = vld [vmem:[#allocation19_spill] sm:$0xff] }
  0xcd   : > { %v819_v39 = vadd.f32 %v2872_v51, %v735_v8  ;;  %v835_v33 = vadd.f32 %v2870_v60, %v751_v37  ;;  %v770_v44 = vadd.f32 %v706_v52, %v536_v11  ;;  %v538_v23 = vmul.f32 %v3443_v34, %v3440_v50 }
  0xce   : > { %1191 = vmatprep.subr.bf16.mxu1 %v952_v38  ;;  %v949_v45 = vpack.c.bf16 %v897_v62, %v881_v43  ;;  %v786_v1 = vadd.f32 %v722_v10, %v552_v9  ;;  %v554_v55 = vmul.f32 %v3443_v34, %v2758_v42  ;;  %v708_v57 = vmul.f32 %v3444_v53, %v2720_v22 }
  0xcf   : > { %v883_v3 = vmax.f32 %v819_v39, 0.0  ;;  %v899_v61 = vmax.f32 %v835_v33, 0.0  ;;  %v854_v63 = vadd.f32 %v2852_v12, %v770_v44  ;;  %v724_v29 = vmul.f32 %v3444_v53, %v2756_v41 }
  0xd0   : > { %1139 = vmatpush1.bf16.msra.mxu0 %v949_v45  ;;  %v870_v47 = vadd.f32 %v2850_v13, %v786_v1  ;;  %v772_v30 = vadd.f32 %v708_v57, %v538_v23  ;;  %v535_v4 = vmul.f32 %v3445_v54, %v3440_v50  ;;  %v551_v0 = vmul.f32 %v3445_v54, %v2758_v42 }
  0xd1   : > { %v951_v5 = vpack.c.bf16 %v899_v61, %v883_v3  ;;  %v918_v18 = vmax.f32 %v854_v63, 0.0  ;;  %v788_v21 = vadd.f32 %v724_v29, %v554_v55  ;;  %v705_v20 = vmul.f32 %v3446_v17, %v2720_v22 }
  0xd2   : > { %v934_v24 = vmax.f32 %v870_v47, 0.0  ;;  %v856_v2 = vadd.f32 %v2852_v12, %v772_v30  ;;  %v721_v6 = vmul.f32 %v3446_v17, %v2756_v41  ;;  %v537_v16 = vmul.f32 %v3447_v15, %v3440_v50 }
  0xd3   : > { %1192 = vmatpush1.bf16.msra.mxu1 %v951_v5  ;;  %v872_v25 = vadd.f32 %v2850_v13, %v788_v21  ;;  %2231 = vmatmul.mubr.msk.bf16.vlgmr.msra.gmra.mxu0 %vm1011_vm0, %v2892_v35  ;;  %v769_v14 = vadd.f32 %v705_v20, %v535_v4  ;;  %v553_v58 = vmul.f32 %v3447_v15, %v2758_v42 }
  0xd4   : > { %v970_v27 = vpack.c.bf16 %v934_v24, %v918_v18  ;;  %v920_v7 = vmax.f32 %v856_v2, 0.0  ;;  %v785_v48 = vadd.f32 %v721_v6, %v551_v0  ;;  %v707_v56 = vmul.f32 %v3448_v49, %v2720_v22  ;;  %1166 = vmatprep.mubr.bf16.mxu0 %v3439_v19 }
  0xd5   : > { %v936_v36 = vmax.f32 %v872_v25, 0.0  ;;  %v853_v11 = vadd.f32 %v2852_v12, %v769_v14  ;;  %v723_v8 = vmul.f32 %v3448_v49, %v2756_v41  ;;  %v504_v37 = vmul.f32 %v3441_v59, %v2790_v32 }
  0xd6   : > { %1242 = vmatprep.subr.bf16.mxu0 %v970_v27  ;;  %2233 = vmatmul.mubr.msk.bf16.vlgmr.msra.gmra.mxu1 %vm1011_vm0, %v2892_v35  ;;  %v869_v9 = vadd.f32 %v2850_v13, %v785_v48  ;;  %v771_v52 = vadd.f32 %v707_v56, %v537_v16  ;;  %v520_v38 = vmul.f32 %v3441_v59, %v2788_v31 }
  0xd7   : > { %v972_v43 = vpack.c.bf16 %v936_v36, %v920_v7  ;;  %v917_v62 = vmax.f32 %v853_v11, 0.0  ;;  %v787_v10 = vadd.f32 %v723_v8, %v553_v58  ;;  %v674_v39 = vmul.f32 %v3442_v28, %v2822_v40  ;;  %1219 = vmatprep.mubr.bf16.mxu1 %v3439_v19  ;;  %v3449_v8 = vld [vmem:[#allocation20_spill] sm:$0xff] }
  0xd8   : > { %v933_v33 = vmax.f32 %v869_v9, 0.0  ;;  %v855_v44 = vadd.f32 %v2852_v12, %v771_v52  ;;  %v690_v23 = vmul.f32 %v3442_v28, %v2820_v46  ;;  %v506_v45 = vmul.f32 %v3443_v34, %v2790_v32 }
  0xd9   : > { %1295 = vmatprep.subr.bf16.mxu1 %v972_v43  ;;  %v871_v59 = vadd.f32 %v2850_v13, %v787_v10  ;;  %v738_v1 = vadd.f32 %v674_v39, %v504_v37  ;;  %v522_v55 = vmul.f32 %v3443_v34, %v2788_v31  ;;  %v676_v57 = vmul.f32 %v3444_v53, %v2822_v40  ;;  %v3450_v43 = vld [vmem:[#allocation21_spill] sm:$0xff] }
  0xda   : > { %v969_v3 = vpack.c.bf16 %v933_v33, %v917_v62  ;;  %v919_v61 = vmax.f32 %v855_v44, 0.0  ;;  %v754_v63 = vadd.f32 %v690_v23, %v520_v38  ;;  %v692_v29 = vmul.f32 %v3444_v53, %v2820_v46  ;;  %v3451_v33 = vld [vmem:[#allocation22_spill] sm:$0xff] }
  0xdb   : > { %v935_v28 = vmax.f32 %v871_v59, 0.0  ;;  %v822_v47 = vadd.f32 %v2872_v51, %v738_v1  ;;  %v740_v30 = vadd.f32 %v676_v57, %v506_v45  ;;  %v503_v4 = vmul.f32 %v3445_v54, %v2790_v32  ;;  %2232 = vmatmul.mubr.msk.bf16.gmra.mxu0 %vm1011_vm0, %v2935_v26  ;;  %v3452_v1 = vld [vmem:[#allocation23_spill] sm:$0xff] }
  0xdc   : > { %1243 = vmatpush1.bf16.msra.mxu0 %v969_v3  ;;  %v838_v34 = vadd.f32 %v2870_v60, %v754_v63  ;;  %v756_v0 = vadd.f32 %v692_v29, %v522_v55  ;;  %v519_v5 = vmul.f32 %v3445_v54, %v2788_v31  ;;  %v673_v53 = vmul.f32 %v3446_v17, %v2822_v40 }
  0xdd   : > { %v971_v18 = vpack.c.bf16 %v935_v28, %v919_v61  ;;  %v886_v21 = vmax.f32 %v822_v47, 0.0  ;;  %v824_v20 = vadd.f32 %v2872_v51, %v740_v30  ;;  %v689_v24 = vmul.f32 %v3446_v17, %v2820_v46  ;;  %1262 = vmatprep.mubr.bf16.mxu0 %v3439_v19  ;;  %v3453_v30 = vld [vmem:[#allocation25_spill] sm:$0xff] }
  0xde   : > { %v902_v2 = vmax.f32 %v838_v34, 0.0  ;;  %v840_v6 = vadd.f32 %v2870_v60, %v756_v0  ;;  %v737_v16 = vadd.f32 %v673_v53, %v503_v4  ;;  %v505_v25 = vmul.f32 %v3447_v15, %v2790_v32  ;;  %2234 = vmatmul.mubr.msk.bf16.gmra.mxu1 %vm1011_vm0, %v2935_v26  ;;  %v3454_v53 = vld [vmem:[#allocation26_spill] sm:$0xff] }
  0xdf   : > { %1296 = vmatpush1.bf16.msra.mxu1 %v971_v18  ;;  %v888_v54 = vmax.f32 %v824_v20, 0.0  ;;  %v753_v14 = vadd.f32 %v689_v24, %v519_v5  ;;  %v521_v58 = vmul.f32 %v3447_v15, %v2788_v31  ;;  %v675_v17 = vmul.f32 %v3448_v49, %v2822_v40  ;;  %1315 = vmatprep.mubr.bf16.mxu1 %v3439_v19 }
  0xe0   : > { %v954_v27 = vpack.c.bf16 %v902_v2, %v886_v21  ;;  %v904_v7 = vmax.f32 %v840_v6, 0.0  ;;  %v821_v48 = vadd.f32 %v2872_v51, %v737_v16  ;;  %v691_v56 = vmul.f32 %v3448_v49, %v2820_v46 }
  0xe1   : > { %v837_v36 = vadd.f32 %v2870_v60, %v753_v14  ;;  %v739_v11 = vadd.f32 %v675_v17, %v505_v25  ;;  %v540_v37 = vmul.f32 %v3449_v8, %v3440_v50  ;;  %v556_v15 = vmul.f32 %v3449_v8, %v2758_v42 }
  0xe2   : > { %1244 = vmatprep.subr.bf16.mxu0 %v954_v27  ;;  %v956_v9 = vpack.c.bf16 %v904_v7, %v888_v54  ;;  %v885_v52 = vmax.f32 %v821_v48, 0.0  ;;  %v755_v38 = vadd.f32 %v691_v56, %v521_v58  ;;  %v710_v62 = vmul.f32 %v3450_v43, %v2720_v22  ;;  %v3455_v54 = vld [vmem:[#allocation27_spill] sm:$0xff]  ;;  %v3456_v7 = vld [vmem:[#allocation28_spill] sm:$0xff] }
  0xe3   : > { %v901_v10 = vmax.f32 %v837_v36, 0.0  ;;  %v823_v39 = vadd.f32 %v2872_v51, %v739_v11  ;;  %v726_v49 = vmul.f32 %v3450_v43, %v2756_v41  ;;  %v542_v44 = vmul.f32 %v3451_v33, %v3440_v50 }
  0xe4   : > { %1297 = vmatprep.subr.bf16.mxu1 %v956_v9  ;;  %v839_v23 = vadd.f32 %v2870_v60, %v755_v38  ;;  %v774_v45 = vadd.f32 %v710_v62, %v540_v37  ;;  %v558_v59 = vmul.f32 %v3451_v33, %v2758_v42  ;;  %v712_v55 = vmul.f32 %v3452_v1, %v2720_v22 }
  0xe5   : > { %v953_v57 = vpack.c.bf16 %v901_v10, %v885_v52  ;;  %v887_v3 = vmax.f32 %v823_v39, 0.0  ;;  %v790_v61 = vadd.f32 %v726_v49, %v556_v15  ;;  %v728_v63 = vmul.f32 %v3452_v1, %v2756_v41 }
  0xe6   : > { %v903_v29 = vmax.f32 %v839_v23, 0.0  ;;  %v858_v28 = vadd.f32 %v2852_v12, %v774_v45  ;;  %v776_v47 = vadd.f32 %v712_v55, %v542_v44  ;;  %v539_v4 = vmul.f32 %v3453_v30, %v3440_v50 }
  0xe7   : > { %1245 = vmatpush1.bf16.msra.mxu0 %v953_v57  ;;  %v874_v34 = vadd.f32 %v2850_v13, %v790_v61  ;;  %v792_v0 = vadd.f32 %v728_v63, %v558_v59  ;;  %v555_v5 = vmul.f32 %v3453_v30, %v2758_v42  ;;  %v709_v18 = vmul.f32 %v3454_v53, %v2720_v22 }
  0xe8   : > { %v955_v21 = vpack.c.bf16 %v903_v29, %v887_v3  ;;  %v922_v20 = vmax.f32 %v858_v28, 0.0  ;;  %v860_v24 = vadd.f32 %v2852_v12, %v776_v47  ;;  %v725_v2 = vmul.f32 %v3454_v53, %v2756_v41 }
  0xe9   : > { %v938_v6 = vmax.f32 %v874_v34, 0.0  ;;  %v876_v16 = vadd.f32 %v2850_v13, %v792_v0  ;;  %v773_v25 = vadd.f32 %v709_v18, %v539_v4  ;;  %v541_v14 = vmul.f32 %v3455_v54, %v3440_v50 }
  0xea   : > { %1298 = vmatpush1.bf16.msra.mxu1 %v955_v21  ;;  %v924_v58 = vmax.f32 %v860_v24, 0.0  ;;  %2235 = vmatmul.mubr.msk.bf16.vlgmr.msra.gmra.mxu0 %vm1011_vm0, %v2892_v35  ;;  %v789_v17 = vadd.f32 %v725_v2, %v555_v5  ;;  %v557_v27 = vmul.f32 %v3455_v54, %v2758_v42  ;;  %v711_v48 = vmul.f32 %v3456_v7, %v2720_v22 }
  0xeb   : > { %v974_v56 = vpack.c.bf16 %v938_v6, %v922_v20  ;;  %v940_v36 = vmax.f32 %v876_v16, 0.0  ;;  %v857_v11 = vadd.f32 %v2852_v12, %v773_v25  ;;  %v727_v37 = vmul.f32 %v3456_v7, %v2756_v41  ;;  %1272 = vmatprep.mubr.bf16.mxu0 %v3439_v19 }
  0xec   : > { %v873_v50 = vadd.f32 %v2850_v13, %v789_v17  ;;  %v775_v15 = vadd.f32 %v711_v48, %v541_v14  ;;  %v508_v9 = vmul.f32 %v3449_v8, %v2790_v32  ;;  %v524_v42 = vmul.f32 %v3449_v8, %v2788_v31 }
  0xed   : > { %1348 = vmatprep.subr.bf16.mxu0 %v974_v56  ;;  %v976_v22 = vpack.c.bf16 %v940_v36, %v924_v58  ;;  %2237 = vmatmul.mubr.msk.bf16.vlgmr.msra.gmra.mxu1 %vm1011_vm0, %v2892_v35  ;;  %v921_v52 = vmax.f32 %v857_v11, 0.0  ;;  %v791_v38 = vadd.f32 %v727_v37, %v557_v27  ;;  %v678_v41 = vmul.f32 %v3450_v43, %v2822_v40 }
  0xee   : > { %v937_v62 = vmax.f32 %v873_v50, 0.0  ;;  %v859_v10 = vadd.f32 %v2852_v12, %v775_v15  ;;  %v694_v39 = vmul.f32 %v3450_v43, %v2820_v46  ;;  %v510_v49 = vmul.f32 %v3451_v33, %v2790_v32  ;;  %1325 = vmatprep.mubr.bf16.mxu1 %v3439_v19  ;;  %v3157_v50 = vpop.permute.xlu1 %998  ;;  %v3159_v15 = vpop.permute.xlu0 %993 }
  0xef   : > { %1401 = vmatprep.subr.bf16.mxu1 %v976_v22  ;;  %v875_v8 = vadd.f32 %v2850_v13, %v791_v38  ;;  %v742_v44 = vadd.f32 %v678_v41, %v508_v9  ;;  %v526_v23 = vmul.f32 %v3451_v33, %v2788_v31  ;;  %v680_v45 = vmul.f32 %v3452_v1, %v2822_v40 }
  0xf0   : > { %v973_v59 = vpack.c.bf16 %v937_v62, %v921_v52  ;;  %v923_v12 = vmax.f32 %v859_v10, 0.0  ;;  %v758_v55 = vadd.f32 %v694_v39, %v524_v42  ;;  %v696_v43 = vmul.f32 %v3452_v1, %v2820_v46 }
  0xf1   : > { %v939_v57 = vmax.f32 %v875_v8, 0.0  ;;  %v826_v3 = vadd.f32 %v2872_v51, %v742_v44  ;;  %v744_v61 = vadd.f32 %v680_v45, %v510_v49  ;;  %v507_v13 = vmul.f32 %v3453_v30, %v2790_v32 }
  0xf2   : > { %1349 = vmatpush1.bf16.msra.mxu0 %v973_v59  ;;  %v842_v63 = vadd.f32 %v2870_v60, %v758_v55  ;;  %v760_v33 = vadd.f32 %v696_v43, %v526_v23  ;;  %v523_v29 = vmul.f32 %v3453_v30, %v2788_v31  ;;  %v677_v28 = vmul.f32 %v3454_v53, %v2822_v40  ;;  %v3161_v41 = vpop.permute.xlu1 %988  ;;  %v3163_v62 = vpop.permute.xlu0 %983 }
  0xf3   : > { %v975_v47 = vpack.c.bf16 %v939_v57, %v923_v12  ;;  %v890_v4 = vmax.f32 %v826_v3, 0.0  ;;  %v828_v1 = vadd.f32 %v2872_v51, %v744_v61  ;;  %v693_v34 = vmul.f32 %v3454_v53, %v2820_v46  ;;  %2236 = vmatmul.mubr.msk.bf16.gmra.mxu0 %vm1011_vm0, %v2935_v26 }
  0xf4   : > { %v906_v0 = vmax.f32 %v842_v63, 0.0  ;;  %v844_v5 = vadd.f32 %v2870_v60, %v760_v33  ;;  %v741_v18 = vadd.f32 %v677_v28, %v507_v13  ;;  %v509_v30 = vmul.f32 %v3455_v54, %v2790_v32  ;;  %1368 = vmatprep.mubr.bf16.mxu0 %v3439_v19 }
  0xf5   : > { %1402 = vmatpush1.bf16.msra.mxu1 %v975_v47  ;;  %v892_v21 = vmax.f32 %v828_v1, 0.0  ;;  %v757_v20 = vadd.f32 %v693_v34, %v523_v29  ;;  %v525_v24 = vmul.f32 %v3455_v54, %v2788_v31  ;;  %v679_v53 = vmul.f32 %v3456_v7, %v2822_v40 }
  0xf6   : > { %v958_v2 = vpack.c.bf16 %v906_v0, %v890_v4  ;;  %v908_v6 = vmax.f32 %v844_v5, 0.0  ;;  %v825_v16 = vadd.f32 %v2872_v51, %v741_v18  ;;  %v695_v25 = vmul.f32 %v3456_v7, %v2820_v46  ;;  %2238 = vmatmul.mubr.msk.bf16.gmra.mxu1 %vm1011_vm0, %v2935_v26 }
  0xf7   : > { %v841_v32 = vadd.f32 %v2870_v60, %v757_v20  ;;  %v743_v14 = vadd.f32 %v679_v53, %v509_v30  ;;  %1421 = vmatprep.mubr.bf16.mxu1 %v3439_v19 }
  0xf8   : > { %1350 = vmatprep.subr.bf16.mxu0 %v958_v2  ;;  %v960_v31 = vpack.c.bf16 %v908_v6, %v892_v21  ;;  %v889_v54 = vmax.f32 %v825_v16, 0.0  ;;  %v759_v58 = vadd.f32 %v695_v25, %v525_v24 }
  0xf9   : > { %v905_v40 = vmax.f32 %v841_v32, 0.0  ;;  %v827_v17 = vadd.f32 %v2872_v51, %v743_v14 }
  0xfa   : > { %1403 = vmatprep.subr.bf16.mxu1 %v960_v31  ;;  %v843_v27 = vadd.f32 %v2870_v60, %v759_v58 }
  0xfb   : > { %v957_v48 = vpack.c.bf16 %v905_v40, %v889_v54  ;;  %v891_v46 = vmax.f32 %v827_v17, 0.0 }
  0xfc   : > { %v907_v7 = vmax.f32 %v843_v27, 0.0 }
  0xfd   : > { %1351 = vmatpush1.bf16.msra.mxu0 %v957_v48 }
  0xfe   : > { %v959_v56 = vpack.c.bf16 %v907_v7, %v891_v46 }
 0x100   : > { %1404 = vmatpush1.bf16.msra.mxu1 %v959_v56  ;;  %2239 = vmatmul.mubr.msk.bf16.vlgmr.msra.gmra.mxu0 %vm1011_vm0, %v2892_v35 }
 0x101   : > { %1378 = vmatprep.mubr.bf16.mxu0 %v3439_v19 }
 0x103   : > { %2241 = vmatmul.mubr.msk.bf16.vlgmr.msra.gmra.mxu1 %vm1011_vm0, %v2892_v35 }
 0x104   : > { %1431 = vmatprep.mubr.bf16.mxu1 %v3439_v19 }
 0x108   : > { %2240 = vmatmul.mubr.msk.bf16.gmra.mxu0 %vm1011_vm0, %v2935_v26 }
 0x109   : > { %1580 = vmatprep.mubr.bf16.mxu0 %v3439_v19 }
 0x10b   : > { %2242 = vmatmul.mubr.msk.bf16.gmra.mxu1 %vm1011_vm0, %v2935_v26 }
 0x10c   : > { %1621 = vmatprep.mubr.bf16.mxu1 %v3439_v19 }
 0x181   : > { %v1052_v60 = vpop.f32.mrf.mxu0 }
 0x182   : > { %v1105_v51 = vpop.f32.mrf.mxu1  ;;  %v1053_v39 = vadd.f32 %v1052_v60, %v3163_v62 }
 0x183   : > { %v1054_v36 = vpop.f32.mrf.mxu0  ;;  %v1106_v24 = vadd.f32 %v1105_v51, %v3163_v62 }
 0x184   : > { %v1107_v11 = vpop.f32.mrf.mxu1  ;;  %v1055_v57 = vadd.f32 %v1054_v36, %v3163_v62  ;;  %v1442_v27 = vmax.f32 %v1053_v39, 0.0 }
 0x185   : > { %v1056_v37 = vpop.f32.mrf.mxu0  ;;  %v1108_v3 = vadd.f32 %v1107_v11, %v3163_v62  ;;  %v1444_v7 = vmax.f32 %v1106_v24, 0.0 }
 0x186   : > { %v1109_v35 = vpop.f32.mrf.mxu1  ;;  %v1057_v33 = vadd.f32 %v1056_v37, %v3161_v41  ;;  %v1443_v53 = vmax.f32 %v1055_v57, 0.0 }
 0x187   : > { %v1058_v9 = vpop.f32.mrf.mxu0  ;;  %v1110_v29 = vadd.f32 %v1109_v35, %v3161_v41  ;;  %v1445_v16 = vmax.f32 %v1108_v3, 0.0  ;;  %v3184_v35 = vld [vmem:[%s3390_s9] sm:$0x3] }
 0x188   : > { %v1111_v42 = vpop.f32.mrf.mxu1  ;;  %v1059_v49 = vadd.f32 %v1058_v9, %v3161_v41  ;;  %v1458_v25 = vmax.f32 %v1057_v33, 0.0 }
 0x189   : > { %v1062_v22 = vpop.f32.mrf.mxu0  ;;  %v1112_v45 = vadd.f32 %v1111_v42, %v3161_v41  ;;  %v1460_v54 = vmax.f32 %v1110_v29, 0.0 }
 0x18a   : > { %v1115_v52 = vpop.f32.mrf.mxu1  ;;  %v1063_v59 = vadd.f32 %v1062_v22, %v3159_v15  ;;  %v1459_v4 = vmax.f32 %v1059_v49, 0.0  ;;  %v1507_v60 = vpack.c.bf16 %v1458_v25, %v1442_v27 }
 0x18b   : > { %v1064_v38 = vpop.f32.mrf.mxu0  ;;  %v1116_v61 = vadd.f32 %v1115_v52, %v3159_v15  ;;  %v1461_v5 = vmax.f32 %v1112_v45, 0.0  ;;  %v1509_v36 = vpack.c.bf16 %v1460_v54, %v1444_v7 }
 0x18c   : > { %v1117_v26 = vpop.f32.mrf.mxu1  ;;  %v1065_v8 = vadd.f32 %v1064_v38, %v3159_v15  ;;  %v1474_v18 = vmax.f32 %v1063_v59, 0.0  ;;  %v1508_v58 = vpack.c.bf16 %v1459_v4, %v1443_v53 }
 0x18d   : > { %v1066_v10 = vpop.f32.mrf.mxu0  ;;  %v1118_v12 = vadd.f32 %v1117_v26, %v3159_v15  ;;  %v1476_v2 = vmax.f32 %v1116_v61, 0.0  ;;  %v1510_v48 = vpack.c.bf16 %v1461_v5, %v1445_v16 }
 0x18e   : > { %v1067_v44 = vadd.f32 %v1066_v10, %v3157_v50  ;;  %v1119_v23 = vpop.f32.mrf.mxu1  ;;  %v1475_v1 = vmax.f32 %v1065_v8, 0.0 }
 0x18f   : > { %v1120_v55 = vadd.f32 %v1119_v23, %v3157_v50  ;;  %v1068_v43 = vpop.f32.mrf.mxu0  ;;  %v1477_v30 = vmax.f32 %v1118_v12, 0.0 }
 0x190   : > { %v1069_v13 = vadd.f32 %v1068_v43, %v3157_v50  ;;  %v1121_v63 = vpop.f32.mrf.mxu1  ;;  %v1490_v28 = vmax.f32 %v1067_v44, 0.0 }
 0x191   : > { %v1122_v47 = vadd.f32 %v1121_v63, %v3157_v50  ;;  %v1492_v34 = vmax.f32 %v1120_v55, 0.0 }
 0x192   : > { %v1491_v0 = vmax.f32 %v1069_v13, 0.0  ;;  %v1523_v32 = vpack.c.bf16 %v1490_v28, %v1474_v18 }
 0x193   : > { %v1493_v21 = vmax.f32 %v1122_v47, 0.0  ;;  %v1158_v20 = vpop.f32.mrf.mxu0  ;;  %v1525_v40 = vpack.c.bf16 %v1492_v34, %v1476_v2 }
 0x194   : > { %v1524_v6 = vpack.c.bf16 %v1491_v0, %v1475_v1  ;;  %v1159_v23 = vadd.f32 %v1158_v20, %v3163_v62 }
 0x195   : > { %v1526_v14 = vpack.c.bf16 %v1493_v21, %v1477_v30  ;;  %v1160_v31 = vpop.f32.mrf.mxu0 }
 0x196   : > { %v1211_v17 = vpop.f32.mrf.mxu1  ;;  %1560 = vmatprep.subr.bf16.mxu0 %v1524_v6  ;;  %v1161_v49 = vadd.f32 %v1160_v31, %v3163_v62  ;;  %v1446_v16 = vmax.f32 %v1159_v23, 0.0 }
 0x197   : > { %v1162_v46 = vpop.f32.mrf.mxu0  ;;  %1601 = vmatprep.subr.bf16.mxu1 %v1526_v14  ;;  %1561 = vmatpush1.bf16.msra.mxu0 %v1523_v32  ;;  %v1212_v53 = vadd.f32 %v1211_v17, %v3163_v62 }
 0x198   : > { %v1213_v56 = vpop.f32.mrf.mxu1  ;;  %1602 = vmatpush1.bf16.msra.mxu1 %v1525_v40  ;;  %1562 = vmatprep.subr.bf16.mxu0 %v1508_v58  ;;  %v1163_v45 = vadd.f32 %v1162_v46, %v3161_v41  ;;  %v1447_v28 = vmax.f32 %v1161_v49, 0.0 }
 0x199   : > { %v1164_v51 = vpop.f32.mrf.mxu0  ;;  %1603 = vmatprep.subr.bf16.mxu1 %v1510_v48  ;;  %v1214_v47 = vadd.f32 %v1213_v56, %v3163_v62  ;;  %v1448_v27 = vmax.f32 %v1212_v53, 0.0 }
 0x19a   : > { %v1215_v11 = vpop.f32.mrf.mxu1  ;;  %v1165_v38 = vadd.f32 %v1164_v51, %v3161_v41  ;;  %v1462_v34 = vmax.f32 %v1163_v45, 0.0 }
 0x19b   : > { %v1168_v37 = vpop.f32.mrf.mxu0  ;;  %1563 = vmatpush1.bf16.msra.mxu0 %v1507_v60  ;;  %v1216_v0 = vadd.f32 %v1215_v11, %v3161_v41  ;;  %v1449_v25 = vmax.f32 %v1214_v47, 0.0 }
 0x19c   : > { %v1217_v9 = vpop.f32.mrf.mxu1  ;;  %1604 = vmatpush1.bf16.msra.mxu1 %v1509_v36  ;;  %v1169_v8 = vadd.f32 %v1168_v37, %v3159_v15  ;;  %v1463_v61 = vmax.f32 %v1165_v38, 0.0  ;;  %v1511_v58 = vpack.c.bf16 %v1462_v34, %v1446_v16 }
 0x19d   : > { %v1170_v42 = vpop.f32.mrf.mxu0  ;;  %v1218_v55 = vadd.f32 %v1217_v9, %v3161_v41  ;;  %v1464_v14 = vmax.f32 %v1216_v0, 0.0 }
 0x19e   : > { %v1221_v22 = vpop.f32.mrf.mxu1  ;;  %2243 = vmatmul.mubr.msk.bf16.vlgmr.msra.gmra.mxu0 %vm1011_vm0, %v3184_v35  ;;  %v1171_v26 = vadd.f32 %v1170_v42, %v3159_v15  ;;  %v1478_v4 = vmax.f32 %v1169_v8, 0.0  ;;  %v1512_v2 = vpack.c.bf16 %v1463_v61, %v1447_v28 }
 0x19f   : > { %v1172_v52 = vpop.f32.mrf.mxu0  ;;  %2244 = vmatmul.mubr.msk.bf16.vlgmr.msra.gmra.mxu1 %vm1011_vm0, %v3184_v35  ;;  %1662 = vmatprep.mubr.bf16.mxu0 %v3439_v19  ;;  %v1222_v13 = vadd.f32 %v1221_v22, %v3159_v15  ;;  %v1465_v30 = vmax.f32 %v1218_v55, 0.0  ;;  %v1513_v17 = vpack.c.bf16 %v1464_v14, %v1448_v27 }
 0x1a0   : > { %v1223_v10 = vpop.f32.mrf.mxu1  ;;  %v1173_v39 = vadd.f32 %v1172_v52, %v3157_v50  ;;  %1703 = vmatprep.mubr.bf16.mxu1 %v3439_v19  ;;  %v1479_v63 = vmax.f32 %v1171_v26, 0.0 }
 0x1a1   : > { %v1174_v44 = vpop.f32.mrf.mxu0  ;;  %v1224_v43 = vadd.f32 %v1223_v10, %v3159_v15  ;;  %v1480_v6 = vmax.f32 %v1222_v13, 0.0  ;;  %v1514_v40 = vpack.c.bf16 %v1465_v30, %v1449_v25 }
 0x1a2   : > { %v1225_v59 = vpop.f32.mrf.mxu1  ;;  %v1175_v12 = vadd.f32 %v1174_v44, %v3157_v50  ;;  %v1494_v57 = vmax.f32 %v1173_v39, 0.0 }
 0x1a3   : > { %v1226_v3 = vadd.f32 %v1225_v59, %v3157_v50  ;;  %v1481_v21 = vmax.f32 %v1224_v43, 0.0 }
 0x1a4   : > { %v1495_v33 = vmax.f32 %v1175_v12, 0.0  ;;  %v1227_v29 = vpop.f32.mrf.mxu1  ;;  %v1527_v20 = vpack.c.bf16 %v1494_v57, %v1478_v4 }
 0x1a5   : > { %v1228_v1 = vadd.f32 %v1227_v29, %v3157_v50  ;;  %v1496_v5 = vmax.f32 %v1226_v3, 0.0 }
 0x1a6   : > { %v1528_v18 = vpack.c.bf16 %v1495_v33, %v1479_v63 }
 0x1a7   : > { %v1497_v24 = vmax.f32 %v1228_v1, 0.0  ;;  %v1529_v31 = vpack.c.bf16 %v1496_v5, %v1480_v6 }
 0x1a8   : > { %1642 = vmatprep.subr.bf16.mxu0 %v1528_v18 }
 0x1a9   : > { %v1530_v32 = vpack.c.bf16 %v1497_v24, %v1481_v21  ;;  %1643 = vmatpush1.bf16.msra.mxu0 %v1527_v20 }
 0x1aa   : > { %v1264_v54 = vpop.f32.mrf.mxu0  ;;  %1644 = vmatprep.subr.bf16.mxu0 %v1512_v2 }
 0x1ab   : > { %1683 = vmatprep.subr.bf16.mxu1 %v1530_v32  ;;  %v1265_v8 = vadd.f32 %v1264_v54, %v3163_v62 }
 0x1ac   : > { %v1266_v48 = vpop.f32.mrf.mxu0  ;;  %1684 = vmatpush1.bf16.msra.mxu1 %v1529_v31 }
 0x1ad   : > { %v1317_v46 = vpop.f32.mrf.mxu1  ;;  %1685 = vmatprep.subr.bf16.mxu1 %v1514_v40  ;;  %1645 = vmatpush1.bf16.msra.mxu0 %v1511_v58  ;;  %v1267_v10 = vadd.f32 %v1266_v48, %v3163_v62  ;;  %v1450_v6 = vmax.f32 %v1265_v8, 0.0 }
 0x1ae   : > { %v1268_v7 = vpop.f32.mrf.mxu0  ;;  %v1318_v20 = vadd.f32 %v1317_v46, %v3163_v62 }
 0x1af   : > { %v1319_v56 = vpop.f32.mrf.mxu1  ;;  %v1269_v44 = vadd.f32 %v1268_v7, %v3161_v41  ;;  %v1451_v33 = vmax.f32 %v1267_v10, 0.0 }
 0x1b0   : > { %v1270_v60 = vpop.f32.mrf.mxu0  ;;  %1686 = vmatpush1.bf16.msra.mxu1 %v1513_v17  ;;  %2245 = vmatmul.mubr.msk.bf16.vlgmr.msra.gmra.mxu0 %vm1011_vm0, %v3184_v35  ;;  %v1320_v29 = vadd.f32 %v1319_v56, %v3163_v62  ;;  %v1452_v27 = vmax.f32 %v1318_v20, 0.0 }
 0x1b1   : > { %v1321_v51 = vpop.f32.mrf.mxu1  ;;  %1744 = vmatprep.mubr.bf16.mxu0 %v3439_v19  ;;  %v1271_v22 = vadd.f32 %v1270_v60, %v3161_v41  ;;  %v1466_v4 = vmax.f32 %v1269_v44, 0.0 }
 0x1b2   : > { %v1322_v1 = vadd.f32 %v1321_v51, %v3161_v41  ;;  %v1453_v16 = vmax.f32 %v1320_v29, 0.0 }
 0x1b3   : > { %v1323_v36 = vpop.f32.mrf.mxu1  ;;  %v1274_v11 = vpop.f32.mrf.mxu0  ;;  %2246 = vmatmul.mubr.msk.bf16.vlgmr.msra.gmra.mxu1 %vm1011_vm0, %v3184_v35  ;;  %v1467_v57 = vmax.f32 %v1271_v22, 0.0  ;;  %v1515_v54 = vpack.c.bf16 %v1466_v4, %v1450_v6 }
 0x1b4   : > { %1785 = vmatprep.mubr.bf16.mxu1 %v3439_v19  ;;  %v1275_v39 = vadd.f32 %v1274_v11, %v3159_v15  ;;  %v1324_v59 = vadd.f32 %v1323_v36, %v3161_v41  ;;  %v1468_v32 = vmax.f32 %v1322_v1, 0.0 }
 0x1b5   : > { %v1276_v37 = vpop.f32.mrf.mxu0  ;;  %v1516_v24 = vpack.c.bf16 %v1467_v57, %v1451_v33 }
 0x1b6   : > { %v1327_v9 = vpop.f32.mrf.mxu1  ;;  %v1277_v52 = vadd.f32 %v1276_v37, %v3159_v15  ;;  %v1482_v28 = vmax.f32 %v1275_v39, 0.0  ;;  %v1469_v5 = vmax.f32 %v1324_v59, 0.0  ;;  %v1517_v17 = vpack.c.bf16 %v1468_v32, %v1452_v27 }
 0x1b7   : > { %v1278_v42 = vpop.f32.mrf.mxu0  ;;  %v1328_v3 = vadd.f32 %v1327_v9, %v3159_v15 }
 0x1b8   : > { %v1329_v38 = vpop.f32.mrf.mxu1  ;;  %v1279_v26 = vadd.f32 %v1278_v42, %v3157_v50  ;;  %v1483_v61 = vmax.f32 %v1277_v52, 0.0  ;;  %v1518_v58 = vpack.c.bf16 %v1469_v5, %v1453_v16 }
 0x1b9   : > { %v1280_v49 = vpop.f32.mrf.mxu0  ;;  %v1330_v12 = vadd.f32 %v1329_v38, %v3159_v15  ;;  %v1484_v53 = vmax.f32 %v1328_v3, 0.0 }
 0x1ba   : > { %v1331_v23 = vpop.f32.mrf.mxu1  ;;  %v1281_v45 = vadd.f32 %v1280_v49, %v3157_v50  ;;  %v1498_v55 = vmax.f32 %v1279_v26, 0.0 }
 0x1bb   : > { %v1332_v43 = vadd.f32 %v1331_v23, %v3157_v50  ;;  %v1485_v18 = vmax.f32 %v1330_v12, 0.0 }
 0x1bc   : > { %v1499_v13 = vmax.f32 %v1281_v45, 0.0  ;;  %v1333_v63 = vpop.f32.mrf.mxu1  ;;  %v1531_v30 = vpack.c.bf16 %v1498_v55, %v1482_v28 }
 0x1bd   : > { %v1334_v47 = vadd.f32 %v1333_v63, %v3157_v50  ;;  %v1500_v34 = vmax.f32 %v1332_v43, 0.0 }
 0x1be   : > { %v1532_v0 = vpack.c.bf16 %v1499_v13, %v1483_v61 }
 0x1bf   : > { %v1501_v21 = vmax.f32 %v1334_v47, 0.0  ;;  %v1533_v14 = vpack.c.bf16 %v1500_v34, %v1484_v53 }
 0x1c0   : > { %v1370_v2 = vpop.f32.mrf.mxu0  ;;  %1724 = vmatprep.subr.bf16.mxu0 %v1532_v0 }
 0x1c1   : > { %v1534_v25 = vpack.c.bf16 %v1501_v21, %v1485_v18  ;;  %1725 = vmatpush1.bf16.msra.mxu0 %v1531_v30  ;;  %v1371_v39 = vadd.f32 %v1370_v2, %v3163_v62 }
 0x1c2   : > { %v1372_v31 = vpop.f32.mrf.mxu0  ;;  %1726 = vmatprep.subr.bf16.mxu0 %v1516_v24 }
 0x1c3   : > { %v1423_v40 = vpop.f32.mrf.mxu1  ;;  %1765 = vmatprep.subr.bf16.mxu1 %v1534_v25  ;;  %v1373_v38 = vadd.f32 %v1372_v31, %v3163_v62  ;;  %v1454_v21 = vmax.f32 %v1371_v39, 0.0 }
 0x1c4   : > { %v1374_v48 = vpop.f32.mrf.mxu0  ;;  %1766 = vmatpush1.bf16.msra.mxu1 %v1533_v14 }
 0x1c5   : > { %v1425_v46 = vpop.f32.mrf.mxu1  ;;  %1767 = vmatprep.subr.bf16.mxu1 %v1518_v58  ;;  %1727 = vmatpush1.bf16.msra.mxu0 %v1515_v54  ;;  %v1375_v49 = vadd.f32 %v1374_v48, %v3161_v41  ;;  %v1455_v61 = vmax.f32 %v1373_v38, 0.0 }
 0x1c6   : > { %v1376_v7 = vpop.f32.mrf.mxu0  ;;  %v1426_v13 = vadd.f32 %v1425_v46, %v3163_v62 }
 0x1c7   : > { %v1427_v56 = vpop.f32.mrf.mxu1  ;;  %v1377_v9 = vadd.f32 %v1376_v7, %v3161_v41  ;;  %v1470_v29 = vmax.f32 %v1375_v49, 0.0 }
 0x1c8   : > { %v1380_v60 = vpop.f32.mrf.mxu0  ;;  %1768 = vmatpush1.bf16.msra.mxu1 %v1517_v17  ;;  %2247 = vmatmul.mubr.msk.bf16.vlgmr.msra.gmra.mxu0 %vm1011_vm0, %v3184_v35  ;;  %v1428_v28 = vadd.f32 %v1427_v56, %v3161_v41  ;;  %v1457_v20 = vmax.f32 %v1426_v13, 0.0  ;;  %v1980_v13 = vstv %s3264_s23 }
 0x1c9   : > { %v1429_v51 = vpop.f32.mrf.mxu1  ;;  %1826 = vmatprep.mubr.bf16.mxu0 %v3439_v19  ;;  %v1381_v26 = vadd.f32 %v1380_v60, %v3159_v15  ;;  %v1471_v12 = vmax.f32 %v1377_v9, 0.0  ;;  %v1519_v2 = vpack.c.bf16 %v1470_v29, %v1454_v21 }
 0x1ca   : > { %v1382_v36 = vpop.f32.mrf.mxu0  ;;  %v1472_v53 = vmax.f32 %v1428_v28, 0.0  ;;  %v1982_v28 = vstv %s1975_s27 }
 0x1cb   : > { %v1433_v11 = vpop.f32.mrf.mxu1  ;;  %2248 = vmatmul.mubr.msk.bf16.vlgmr.msra.gmra.mxu1 %vm1011_vm0, %v3184_v35  ;;  %v1383_v42 = vadd.f32 %v1382_v36, %v3159_v15  ;;  %v1486_v63 = vmax.f32 %v1381_v26, 0.0  ;;  %v1520_v18 = vpack.c.bf16 %v1471_v12, %v1455_v61  ;;  %v1979_v61 = vstv %s3262_s18  ;;  %s2400_s18 = sshll.u32 %s2462_s26, 4  ;;  %s2401_s18 = int_to_ptr.vmem [resolvable:$false] %s2400_s18 }
 0x1cc   : > { %v1384_v37 = vpop.f32.mrf.mxu0  ;;  %1867 = vmatprep.mubr.bf16.mxu1 %v3439_v19  ;;  %v1430_v19 = vadd.f32 %v1429_v51, %v3161_v41  ;;  %v1434_v55 = vadd.f32 %v1433_v11, %v3159_v15  ;;  %s2402_s23 = scalar_lea.vmem %s2401_s18, 2048  ;;  %p2403_p5 = scmp.lt.s32.totalorder %s2152_s16, %s2401_s18 }
 0x1cd   : > { %v1435_v22 = vpop.f32.mrf.mxu1  ;;  %v1385_v52 = vadd.f32 %v1384_v37, %v3157_v50  ;;  %v1487_v43 = vmax.f32 %v1383_v42, 0.0  ;;  %p2404_p6 = scmp.lt.s32.totalorder %s2402_s23, %s2396_s12 }
 0x1ce   : > { %v1386_v10 = vpop.f32.mrf.mxu0  ;;  %v1436_v23 = vadd.f32 %v1435_v22, %v3159_v15  ;;  %v1473_v1 = vmax.f32 %v1430_v19, 0.0  ;;  %v1424_v15 = vadd.f32 %v1423_v40, %v3163_v62  ;;  %v1488_v30 = vmax.f32 %v1434_v55, 0.0  ;;  %v3256_v62 = vpop.permute.xlu0 %1542 }
 0x1cf   : > { %v1437_v8 = vpop.f32.mrf.mxu1  ;;  %v1387_v44 = vadd.f32 %v1386_v10, %v3157_v50  ;;  %v1502_v45 = vmax.f32 %v1385_v52, 0.0  ;;  %p2405_p7 = por %p2404_p6, %p2403_p5 }
 0x1d0   : > { %v1438_v59 = vadd.f32 %v1437_v8, %v3157_v50  ;;  %v1489_v34 = vmax.f32 %v1436_v23, 0.0  ;;  %v1522_v41 = vpack.c.bf16 %v1473_v1, %v1457_v20  ;;  %v1456_v6 = vmax.f32 %v1424_v15, 0.0 }
 0x1d1   : > { %v1503_v57 = vmax.f32 %v1387_v44, 0.0  ;;  %v1439_v3 = vpop.f32.mrf.mxu1  ;;  %v1535_v0 = vpack.c.bf16 %v1502_v45, %v1486_v63  ;;  %p2406_p8 = pnand %p2405_p7, %p2399_p4 }
 0x1d2   : > { %v1440_v33 = vadd.f32 %v1439_v3, %v3157_v50  ;;  %v1504_v47 = vmax.f32 %v1438_v59, 0.0  ;;  %v1521_v16 = vpack.c.bf16 %v1472_v53, %v1456_v6 }
 0x1d3   : > { %v1536_v4 = vpack.c.bf16 %v1503_v57, %v1487_v43  ;;  %v3457_v57 = vld [vmem:[#allocation10_spill] sm:$0xff] }
 0x1d4   : > { %v1505_v5 = vmax.f32 %v1440_v33, 0.0  ;;  %v1537_v50 = vpack.c.bf16 %v1504_v47, %v1488_v30  ;;  %vm1976_vm1 = vcmp.eq.s32.totalorder %v3457_v57, 1  ;;  %vm1974_vm2 = vcmp.eq.s32.totalorder %v3457_v57, 0 }
 0x1d5   : > { %1806 = vmatprep.subr.bf16.mxu0 %v1536_v4  ;;  %v1981_v29 = vsel %vm1976_vm1, %v1979_v61, %v1980_v13 }
 0x1d6   : > { %v1538_v24 = vpack.c.bf16 %v1505_v5, %v1489_v34  ;;  %1807 = vmatpush1.bf16.msra.mxu0 %v1535_v0  ;;  %v3274_v47 = vsel %vm1974_vm2, %v1982_v28, %v1981_v29  ;;  %v3458_v0 = vld [vmem:[#allocation11_spill] sm:$0xff] }
 0x1d7   : > { %1808 = vmatprep.subr.bf16.mxu0 %v1520_v18 }
 0x1d8   : > { %1847 = vmatprep.subr.bf16.mxu1 %v1538_v24 }
 0x1d9   : > { %1848 = vmatpush1.bf16.msra.mxu1 %v1537_v50 }
 0x1da   : > { %1849 = vmatprep.subr.bf16.mxu1 %v1522_v41  ;;  %1809 = vmatpush1.bf16.msra.mxu0 %v1519_v2 }
 0x1dd   : > { %1850 = vmatpush1.bf16.msra.mxu1 %v1521_v16  ;;  %2249 = vmatmul.mubr.msk.bf16.vlgmr.msra.gmra.mxu0 %vm1011_vm0, %v3184_v35 }
 0x1e0   : > { %2250 = vmatmul.mubr.msk.bf16.vlgmr.msra.gmra.mxu1 %vm1011_vm0, %v3184_v35 }
 0x25e   : > { %v1582_v25 = vpop.f32.mrf.mxu0 }
 0x25f   : > { %v1583_v32 = vadd.f32 %v1582_v25, %v3256_v62  ;;  %v1623_v14 = vpop.f32.mrf.mxu1 }
 0x260   : > { %v1624_v31 = vadd.f32 %v1623_v14, %v3256_v62  ;;  %v1584_v54 = vpop.f32.mrf.mxu0 }
 0x261   : > { %v2251_v58 = vmul.f32 -1.442695, %v1583_v32  ;;  %v1585_v40 = vadd.f32 %v1584_v54, %v3256_v62  ;;  %v1625_v27 = vpop.f32.mrf.mxu1 }
 0x262   : > { %v2253_v48 = vmul.f32 -1.442695, %v1624_v31  ;;  %v1626_v46 = vadd.f32 %v1625_v27, %v3256_v62  ;;  %v1586_v17 = vpop.f32.mrf.mxu0 }
 0x263   : > { %2320 = vpow2.f32 %v2251_v58  ;;  %v2252_v7 = vmul.f32 -1.442695, %v1585_v40  ;;  %v1627_v35 = vpop.f32.mrf.mxu1 }
 0x264   : > { %2322 = vpow2.f32 %v2253_v48  ;;  %v2254_v56 = vmul.f32 -1.442695, %v1626_v46  ;;  %v1587_v60 = vpop.f32.mrf.mxu0 }
 0x265   : > { %2324 = vpow2.f32 %v2252_v7  ;;  %v1628_v51 = vpop.f32.mrf.mxu1 }
 0x266   : > { %2326 = vpow2.f32 %v2254_v56 }
 0x270   : > { %v2321_v36 = vpop.eup %2320  ;;  %v1664_v11 = vpop.f32.mrf.mxu0 }
 0x271   : > { %v2323_v37 = vpop.eup %2322  ;;  %v1924_v9 = vadd.f32 1.0, %v2321_v36  ;;  %v1665_v42 = vadd.f32 %v1664_v11, %v3256_v62 }
 0x272   : > { %v2325_v22 = vpop.eup %2324  ;;  %v1926_v52 = vadd.f32 1.0, %v2323_v37  ;;  %v1666_v38 = vpop.f32.mrf.mxu0 }
 0x273   : > { %v2327_v26 = vpop.eup %2326  ;;  %2328 = vrcp.f32 %v1924_v9  ;;  %v1925_v10 = vadd.f32 1.0, %v2325_v22  ;;  %v2255_v39 = vmul.f32 -1.442695, %v1665_v42  ;;  %v1705_v49 = vpop.f32.mrf.mxu1  ;;  %v1667_v8 = vadd.f32 %v1666_v38, %v3256_v62 }
 0x274   : > { %2330 = vrcp.f32 %v1926_v52  ;;  %v1927_v44 = vadd.f32 1.0, %v2327_v26  ;;  %v1706_v19 = vadd.f32 %v1705_v49, %v3256_v62  ;;  %v1668_v23 = vpop.f32.mrf.mxu0 }
 0x275   : > { %2332 = vrcp.f32 %v1925_v10  ;;  %v2256_v45 = vmul.f32 -1.442695, %v1667_v8  ;;  %v1707_v59 = vpop.f32.mrf.mxu1 }
 0x276   : > { %2334 = vrcp.f32 %v1927_v44  ;;  %v2257_v12 = vmul.f32 -1.442695, %v1706_v19  ;;  %v1708_v55 = vadd.f32 %v1707_v59, %v3256_v62  ;;  %v1669_v43 = vpop.f32.mrf.mxu0 }
 0x277   : > { %2336 = vpow2.f32 %v2255_v39  ;;  %v1709_v3 = vpop.f32.mrf.mxu1 }
 0x278   : > { %2338 = vpow2.f32 %v2257_v12  ;;  %v2258_v63 = vmul.f32 -1.442695, %v1708_v55 }
 0x279   : > { %2340 = vpow2.f32 %v2256_v45  ;;  %v1710_v33 = vpop.f32.mrf.mxu1 }
 0x27a   : > { %2342 = vpow2.f32 %v2258_v63 }
 0x280   : > { %v2329_v4 = vpop.eup %2328 }
 0x281   : > { %v2331_v1 = vpop.eup %2330  ;;  %v1984_v34 = vsub.f32 %v2329_v4, %v3274_v47  ;;  %v2003_v5 = vrot.slane %v2329_v4, %v3458_v0 }
 0x282   : > { %v2333_v15 = vpop.eup %2332  ;;  %v1986_v18 = vsub.f32 %v2331_v1, %v3274_v47  ;;  %v2011_v30 = vrot.slane %v2331_v1, %v3458_v0 }
 0x283   : > { %v2335_v21 = vpop.eup %2334  ;;  %v2064_v20 = vmul.f32 %v2003_v5, %v1984_v34  ;;  %v1985_v24 = vsub.f32 %v2333_v15, %v3274_v47  ;;  %v2007_v53 = vrot.slane %v2333_v15, %v3458_v0 }
 0x284   : > { %v2337_v50 = vpop.eup %2336  ;;  %v2066_v2 = vmul.f32 %v2011_v30, %v1986_v18  ;;  %v1987_v41 = vsub.f32 %v2335_v21, %v3274_v47  ;;  %v2015_v6 = vrot.slane %v2335_v21, %v3458_v0 }
 0x285   : > { %v2339_v16 = vpop.eup %2338  ;;  %v2065_v25 = vmul.f32 %v2007_v53, %v1985_v24  ;;  %v1928_v32 = vadd.f32 1.0, %v2337_v50  ;;  %v2080_v40 = vadd.f32 %v2064_v20, %v3274_v47 }
 0x286   : > { %v2341_v14 = vpop.eup %2340  ;;  %v2067_v31 = vmul.f32 %v2015_v6, %v1987_v41  ;;  %v1930_v54 = vadd.f32 1.0, %v2339_v16  ;;  %v2082_v46 = vadd.f32 %v2066_v2, %v3274_v47 }
 0x287   : > { %v2343_v58 = vpop.eup %2342  ;;  %v2081_v27 = vadd.f32 %v2065_v25, %v3274_v47  ;;  %2344 = vrcp.f32 %v1928_v32  ;;  %v1929_v48 = vadd.f32 1.0, %v2341_v14 }
 0x288   : > { %v2083_v17 = vadd.f32 %v2067_v31, %v3274_v47  ;;  %2346 = vrcp.f32 %v1930_v54  ;;  %v1931_v7 = vadd.f32 1.0, %v2343_v58  ;;  %v1746_v35 = vpop.f32.mrf.mxu0 }
 0x289   : > { %v2112_v56 = vcombine.low %v2080_v40, %v2081_v27  ;;  %2348 = vrcp.f32 %v1929_v48  ;;  %v1747_v60 = vadd.f32 %v1746_v35, %v3256_v62 }
 0x28a   : > { %v2113_v51 = vcombine.low %v2082_v46, %v2083_v17  ;;  %2350 = vrcp.f32 %v1931_v7  ;;  %v1748_v36 = vpop.f32.mrf.mxu0 }
 0x28b   : > { %2128 = vst [vmem:[%s3292_s19] sm:$0x77] %v2112_v56  ;;  %v2259_v11 = vmul.f32 -1.442695, %v1747_v60  ;;  %v1787_v37 = vpop.f32.mrf.mxu1  ;;  %v1749_v9 = vadd.f32 %v1748_v36, %v3256_v62 }
 0x28c   : > { %2129 = vst [vmem:[%s3292_s19 + $0x8] sm:$0x77] %v2113_v51  ;;  %v1788_v42 = vadd.f32 %v1787_v37, %v3256_v62  ;;  %v1750_v22 = vpop.f32.mrf.mxu0 }
 0x28d   : > { %2352 = vpow2.f32 %v2259_v11  ;;  %v2260_v52 = vmul.f32 -1.442695, %v1749_v9  ;;  %v1789_v38 = vpop.f32.mrf.mxu1 }
 0x28e   : > { %v2261_v26 = vmul.f32 -1.442695, %v1788_v42  ;;  %v1790_v10 = vadd.f32 %v1789_v38, %v3256_v62  ;;  %v1751_v39 = vpop.f32.mrf.mxu0 }
 0x28f   : > { %2354 = vpow2.f32 %v2260_v52  ;;  %v1791_v49 = vpop.f32.mrf.mxu1 }
 0x290   : > { %2356 = vpow2.f32 %v2261_v26  ;;  %v2262_v8 = vmul.f32 -1.442695, %v1790_v10 }
 0x291   : > { %v1792_v44 = vpop.f32.mrf.mxu1 }
 0x292   : > { %2358 = vpow2.f32 %v2262_v8 }
 0x294   : > { %v2345_v19 = vpop.eup %2344 }
 0x295   : > { %v2347_v23 = vpop.eup %2346  ;;  %v1988_v45 = vsub.f32 %v2345_v19, %v3274_v47  ;;  %v2019_v59 = vrot.slane %v2345_v19, %v3458_v0 }
 0x296   : > { %v2349_v12 = vpop.eup %2348  ;;  %v1990_v55 = vsub.f32 %v2347_v23, %v3274_v47  ;;  %v2027_v43 = vrot.slane %v2347_v23, %v3458_v0 }
 0x297   : > { %v2351_v57 = vpop.eup %2350  ;;  %v2068_v3 = vmul.f32 %v2019_v59, %v1988_v45  ;;  %v1989_v61 = vsub.f32 %v2349_v12, %v3274_v47  ;;  %v2023_v13 = vrot.slane %v2349_v12, %v3458_v0 }
 0x298   : > { %v2070_v63 = vmul.f32 %v2027_v43, %v1990_v55  ;;  %v1991_v33 = vsub.f32 %v2351_v57, %v3274_v47  ;;  %v2031_v29 = vrot.slane %v2351_v57, %v3458_v0 }
 0x299   : > { %v2069_v28 = vmul.f32 %v2023_v13, %v1989_v61  ;;  %v2084_v34 = vadd.f32 %v2068_v3, %v3274_v47 }
 0x29a   : > { %v2353_v4 = vpop.eup %2352  ;;  %v2071_v1 = vmul.f32 %v2031_v29, %v1991_v33  ;;  %v2086_v30 = vadd.f32 %v2070_v63, %v3274_v47 }
 0x29b   : > { %v2085_v5 = vadd.f32 %v2069_v28, %v3274_v47  ;;  %v1932_v15 = vadd.f32 1.0, %v2353_v4 }
 0x29c   : > { %v2355_v18 = vpop.eup %2354  ;;  %v2087_v21 = vadd.f32 %v2071_v1, %v3274_v47 }
 0x29d   : > { %v2357_v20 = vpop.eup %2356  ;;  %v2114_v24 = vcombine.low %v2084_v34, %v2085_v5  ;;  %2360 = vrcp.f32 %v1932_v15  ;;  %v1933_v53 = vadd.f32 1.0, %v2355_v18  ;;  %v1828_v50 = vpop.f32.mrf.mxu0 }
 0x29e   : > { %v2115_v2 = vcombine.low %v2086_v30, %v2087_v21  ;;  %v1934_v41 = vadd.f32 1.0, %v2357_v20  ;;  %v1829_v6 = vadd.f32 %v1828_v50, %v3256_v62 }
 0x29f   : > { %v2359_v16 = vpop.eup %2358  ;;  %2130 = vst [vmem:[%s3292_s19 + $0x10] sm:$0x77] %v2114_v24  ;;  %2362 = vrcp.f32 %v1933_v53  ;;  %v1830_v25 = vpop.f32.mrf.mxu0 }
 0x2a0   : > { %2131 = vst [vmem:[%s3292_s19 + $0x18] sm:$0x77] %v2115_v2  ;;  %2364 = vrcp.f32 %v1934_v41  ;;  %v1935_v32 = vadd.f32 1.0, %v2359_v16  ;;  %v2263_v14 = vmul.f32 -1.442695, %v1829_v6  ;;  %v1869_v31 = vpop.f32.mrf.mxu1  ;;  %v1831_v54 = vadd.f32 %v1830_v25, %v3256_v62 }
 0x2a1   : > { %v1870_v58 = vadd.f32 %v1869_v31, %v3256_v62  ;;  %v1832_v40 = vpop.f32.mrf.mxu0 }
 0x2a2   : > { %2366 = vrcp.f32 %v1935_v32  ;;  %v2264_v27 = vmul.f32 -1.442695, %v1831_v54  ;;  %v1871_v48 = vpop.f32.mrf.mxu1 }
 0x2a3   : > { %2368 = vpow2.f32 %v2263_v14  ;;  %v2265_v46 = vmul.f32 -1.442695, %v1870_v58  ;;  %v1872_v17 = vadd.f32 %v1871_v48, %v3256_v62  ;;  %v1833_v7 = vpop.f32.mrf.mxu0 }
 0x2a4   : > { %2370 = vpow2.f32 %v2264_v27  ;;  %v1873_v35 = vpop.f32.mrf.mxu1 }
 0x2a5   : > { %2372 = vpow2.f32 %v2265_v46  ;;  %v2266_v56 = vmul.f32 -1.442695, %v1872_v17 }
 0x2a6   : > { %v1874_v60 = vpop.f32.mrf.mxu1 }
 0x2a7   : > { %2374 = vpow2.f32 %v2266_v56 }
 0x2aa   : > { %v2361_v51 = vpop.eup %2360 }
 0x2ab   : > { %v1992_v36 = vsub.f32 %v2361_v51, %v3274_v47  ;;  %v2035_v11 = vrot.slane %v2361_v51, %v3458_v0 }
 0x2ac   : > { %v2363_v37 = vpop.eup %2362 }
 0x2ad   : > { %v2365_v9 = vpop.eup %2364  ;;  %v2072_v42 = vmul.f32 %v2035_v11, %v1992_v36  ;;  %v1993_v22 = vsub.f32 %v2363_v37, %v3274_v47  ;;  %v2039_v52 = vrot.slane %v2363_v37, %v3458_v0 }
 0x2ae   : > { %v1994_v62 = vsub.f32 %v2365_v9, %v3274_v47  ;;  %v2043_v38 = vrot.slane %v2365_v9, %v3458_v0 }
 0x2af   : > { %v2367_v26 = vpop.eup %2366  ;;  %v2073_v10 = vmul.f32 %v2039_v52, %v1993_v22  ;;  %v2088_v23 = vadd.f32 %v2072_v42, %v3274_v47 }
 0x2b0   : > { %v2369_v39 = vpop.eup %2368  ;;  %v2074_v49 = vmul.f32 %v2043_v38, %v1994_v62  ;;  %v1995_v8 = vsub.f32 %v2367_v26, %v3274_v47  ;;  %v2047_v44 = vrot.slane %v2367_v26, %v3458_v0 }
 0x2b1   : > { %v2371_v19 = vpop.eup %2370  ;;  %v2089_v45 = vadd.f32 %v2073_v10, %v3274_v47  ;;  %v1936_v59 = vadd.f32 1.0, %v2369_v39 }
 0x2b2   : > { %v2373_v12 = vpop.eup %2372  ;;  %v2075_v55 = vmul.f32 %v2047_v44, %v1995_v8  ;;  %v1937_v43 = vadd.f32 1.0, %v2371_v19  ;;  %v2090_v13 = vadd.f32 %v2074_v49, %v3274_v47 }
 0x2b3   : > { %v2116_v57 = vcombine.low %v2088_v23, %v2089_v45  ;;  %2376 = vrcp.f32 %v1936_v59  ;;  %v1938_v3 = vadd.f32 1.0, %v2373_v12 }
 0x2b4   : > { %v2375_v61 = vpop.eup %2374  ;;  %v2091_v63 = vadd.f32 %v2075_v55, %v3274_v47  ;;  %2378 = vrcp.f32 %v1937_v43 }
 0x2b5   : > { %2132 = vst [vmem:[%s3292_s19 + $0x20] sm:$0x77] %v2116_v57  ;;  %2380 = vrcp.f32 %v1938_v3  ;;  %v1939_v33 = vadd.f32 1.0, %v2375_v61 }
 0x2b6   : > { %v2117_v29 = vcombine.low %v2090_v13, %v2091_v63 }
 0x2b7   : > { %2382 = vrcp.f32 %v1939_v33 }
 0x2b8   : > { %2133 = vst [vmem:[%s3292_s19 + $0x28] sm:$0x77] %v2117_v29 }
 0x2c0   : > { %v2377_v28 = vpop.eup %2376 }
 0x2c1   : > { %v2379_v4 = vpop.eup %2378  ;;  %v1996_v1 = vsub.f32 %v2377_v28, %v3274_v47  ;;  %v2051_v34 = vrot.slane %v2377_v28, %v3458_v0 }
 0x2c2   : > { %v2381_v5 = vpop.eup %2380  ;;  %v1997_v15 = vsub.f32 %v2379_v4, %v3274_v47  ;;  %v2055_v18 = vrot.slane %v2379_v4, %v3458_v0 }
 0x2c3   : > { %v2076_v30 = vmul.f32 %v2051_v34, %v1996_v1  ;;  %v1998_v21 = vsub.f32 %v2381_v5, %v3274_v47  ;;  %v2059_v20 = vrot.slane %v2381_v5, %v3458_v0 }
 0x2c4   : > { %v2383_v24 = vpop.eup %2382  ;;  %v2077_v53 = vmul.f32 %v2055_v18, %v1997_v15 }
 0x2c5   : > { %v2078_v50 = vmul.f32 %v2059_v20, %v1998_v21  ;;  %v1999_v2 = vsub.f32 %v2383_v24, %v3274_v47  ;;  %v2063_v41 = vrot.slane %v2383_v24, %v3458_v0  ;;  %v2092_v6 = vadd.f32 %v2076_v30, %v3274_v47 }
 0x2c6   : > { %v2093_v16 = vadd.f32 %v2077_v53, %v3274_v47 }
 0x2c7   : > { %v2079_v25 = vmul.f32 %v2063_v41, %v1999_v2  ;;  %v2094_v14 = vadd.f32 %v2078_v50, %v3274_v47 }
 0x2c8   : > { %v2118_v32 = vcombine.low %v2092_v6, %v2093_v16 }
 0x2c9   : > { %v2095_v31 = vadd.f32 %v2079_v25, %v3274_v47 }
 0x2ca   : > { %2134 = vst [vmem:[%s3292_s19 + $0x30] sm:$0x77] %v2118_v32 }
 0x2cb   : > { %v2119_v54 = vcombine.low %v2094_v14, %v2095_v31 }
 0x2cd   : > { %2135 = vst [vmem:[%s3292_s19 + $0x38] sm:$0x77] %v2119_v54 }
 0x2ce   : > { %2409 = shalt.err (!%p2406_p8)
}
 0x2cf   : > { %s2410_s27 = scalar_lea.hbm %s2149_s21, 1024  ;;  %s2414_s19 = scalar_lea.hbm %s3392_s11, 2048 }
 0x2d0   : > { %p2411_p9 = scmp.ne.s32.totalorder %s2149_s21, %s2410_s27  ;;  %p2415_p0 = scmp.lt.s32.totalorder %s2149_s21, %s3392_s11 }
 0x2d1   : > { %p2416_p1 = scmp.lt.s32.totalorder %s2414_s19, %s2410_s27 }
 0x2d2   : > { %p2412_p12 = pnand %p2411_p9, %p2567_p10 }
 0x2d3   : > { %p2417_p2 = por %p2416_p1, %p2415_p0 }
 0x2d4   : > { %p2413_p13 = pneg %p2412_p12 }
 0x2d6   : > { %p2418_p3 = pnand %p2417_p2, %p2413_p13 }
 0x2d8   : > { %2421 = shalt.err (!%p2418_p3)
}
 0x2d9   : > { %2275 = dma.vmem_to_hbm [thread:$0]  (%p2567_p10), %s2152_s16, 1024, %s2149_s21, %s2137_s22  }
 0x2da PF: > { %p2281_p4 = scmp.ge.s32.totalorder %s2458_s25, 2  ;;  %s2163_s20 = sand.u32 1, %s2446_s0  }
 0x2db   : > { %s2164_s12 = scalar_lea.sflag [#allocation6], %s2163_s20 }
 0x2dc   : > { %p2278_p5 = pnand %p2281_p4, %p2571_p11 }
 0x2de   : > { %p2279_p6 = pneg %p2278_p5 }
 0x2e0   : > { %2441 = dma.done.wait (%p2279_p6), %s2164_s12, 1024  }
 0x2e1   : > { %2443 = vsyncadd (%p2279_p6), %s2164_s12, 4294966272  ;;  %s3459_s26 = sld [smem:[#allocation9_spill]]  ;;  %p28_p7 = scmp.ge.s32.totalorder %s2554_s28, 4  }
 0x2e2   : > { %s3460_s0 = smov %s2450_s24  ;;  %s3461_s24 = smov %s2454_s1 }
 0x2e3   : > { %s3463_s25 = smov %s2554_s28  ;;  %30 = sbr.rel (!%p28_p7) target bundleno = 18 (0x12), region = 94 }
 0x2e7   : > { %s3462_s1 = smov %s3459_s26 }
 0x2e8   :  { %2169 = vsyncpa [#allocation6], 1 }
 0x2e9   :  { %2171 = vsyncpa [#allocation6 + $0x1], 1 }

</bundles_post_ra>
